<compile_context>
chip_gen: v5e
topology: v5e:2x2
jax: 0.10.0
libtpu: 0.0.40
codegen_flags: <defaults>
</compile_context>

<pallas_src>
import functools

import jax
import jax.numpy as jnp
from jax.experimental import pallas as pl
from jax.experimental.pallas import tpu as pltpu


def _round_up(x, m):
    return (x + m - 1) // m * m


def _num_tensorcores():
    """Best-effort TensorCores-per-device count (only affects tile choice)."""
    try:
        kind = (getattr(jax.devices()[0], "device_kind", "") or "").lower()
    except Exception:
        return 1
    if "lite" in kind or "v5e" in kind or "v6e" in kind:
        return 1                       # v5e / v6e: single TensorCore
    if any(k in kind for k in ("v7", "v5p", "v4", "v3", "v2")):
        return 2                       # v7x + megacore generations: 2 TCs
    return 1


# ----------------------------------------------------------------------------
# Kernel: Linear -> tanh -> Linear -> tanh -> fused head matmul -> floor clamp
# ----------------------------------------------------------------------------
def gmm_fused_kernel(x_ref, w1_ref, b1_ref, w2_ref, b2_ref,
                     wh_ref, bh_ref, floor_ref, out_ref):
    x = x_ref[...]

    # Backbone (hidden lane-padded to 128 in the wrapper; pad lanes stay 0
    # through tanh and contribute nothing downstream — exact).
    h1 = jnp.tanh(
        jnp.dot(x, w1_ref[...], preferred_element_type=jnp.float32) + b1_ref[...]
    )
    h2 = jnp.tanh(
        jnp.dot(h1, w2_ref[...], preferred_element_type=jnp.float32) + b2_ref[...]
    )

    # Fused head (third Linear w3/b3 folded into [alphas|means|sigmas] heads).
    head = jnp.dot(h2, wh_ref[...], preferred_element_type=jnp.float32) + bh_ref[...]

    # clamp_min(raw,-5)-5 == max(raw-5, -10); the -5 is pre-folded into the
    # sigma bias, so a single vmax against the precomputed floor row suffices
    # (floor = -inf on alpha/mean columns, -10 on sigma columns).
    out_ref[...] = jnp.maximum(head, floor_ref[...])


# ----------------------------------------------------------------------------
# One-time (out of the per-call path) weight preparation.
# ----------------------------------------------------------------------------
def prepare_params(params, *, mixture_size, targets, lane=128):
    f32 = jnp.float32
    hidden_dim = params["w1"].shape[1]
    tm = targets * mixture_size
    head_out = mixture_size + 2 * tm            # [alphas | means | raw_sigmas]
    # Single narrow fused head; mixture_size*(1+2*targets) > 128 would need a
    # multi-slab head.
    assert head_out <= 128, "fused head assumed to fit one 128-lane slab"

    hp = _round_up(hidden_dim, lane)            # lane-pad hidden for full vregs

    w1p = jnp.pad(params["w1"].astype(f32), ((0, 0), (0, hp - hidden_dim)))
    b1p = jnp.pad(params["b1"].astype(f32), ((0, 0), (0, hp - hidden_dim)))
    w2p = jnp.pad(params["w2"].astype(f32),
                  ((0, hp - hidden_dim), (0, hp - hidden_dim)))
    b2p = jnp.pad(params["b2"].astype(f32), ((0, 0), (0, hp - hidden_dim)))

    # Fold w3/b3 into the concatenated heads (no nonlinearity between them).
    w_cat = jnp.concatenate(
        [params["wa"], params["wm"], params["ws"]], axis=1).astype(f32)
    b_cat = jnp.concatenate(
        [params["ba"], params["bm"], params["bs"]], axis=1).astype(f32)
    w_head = params["w3"].astype(f32) @ w_cat            # [hidden, head_out]
    b_head = params["b3"].astype(f32) @ w_cat + b_cat    # [1, head_out]

    # Fold the "-5" of clamp_min(x,-5)-5 into the sigma bias; the clamp itself
    # becomes max(., floor).
    sig_start = mixture_size + tm
    b_head = b_head.at[:, sig_start:].add(-5.0)
    floor = jnp.concatenate(
        [jnp.full((1, sig_start), -jnp.inf, f32),
         jnp.full((1, tm), -10.0, f32)], axis=1)

    w_headp = jnp.pad(w_head, ((0, hp - hidden_dim), (0, 0)))   # [hp, head_out]

    return {"w1p": w1p, "b1p": b1p, "w2p": w2p, "b2p": b2p,
            "w_headp": w_headp, "b_headp": b_head, "floor": floor}


# ----------------------------------------------------------------------------
# Forward wrapper.
# ----------------------------------------------------------------------------
def gmm_forward(x, pp, *, mixture_size, targets, block_n=1024,
                num_tensorcores=1):
    """x: [N, input_dim] float32; pp: prepare_params() output.

    Returns (alphas [N,M], means [N,T,M], log_sigmas [N,T,M])."""
    N, input_dim = x.shape
    f32 = jnp.float32
    tm = targets * mixture_size
    head_out = mixture_size + 2 * tm

    # ---- batch tiling (generation-aware) ------------------------------------
    n8 = _round_up(N, 8)
    bn = max(8, min(_round_up(block_n, 8), n8))
    if num_tensorcores >= 2 and n8 >= 16:
        # Keep >= num_tensorcores "parallel" grid steps so every TC gets work.
        bn = min(bn, max(8, (n8 // num_tensorcores) // 8 * 8))
    Np = _round_up(N, bn)
    xp = x.astype(f32)
    if Np != N:
        xp = jnp.pad(xp, ((0, Np - N), (0, 0)))
    grid = (Np // bn,)

    def batch_spec(cols):
        return pl.BlockSpec((bn, cols), lambda i: (i, 0))

    def const_spec(shape):
        return pl.BlockSpec(shape, lambda i: (0, 0))   # VMEM-resident weights

    out = pl.pallas_call(
        gmm_fused_kernel,
        # Narrow f32 output (head_out columns) — full last dim, so the block
        # is legal; avoids the 8.5x HBM write amplification of a 128-wide
        # padded slab at the cost of masked stores.
        out_shape=jax.ShapeDtypeStruct((Np, head_out), f32),
        grid_spec=pl.GridSpec(
            grid=grid,
            in_specs=[
                batch_spec(input_dim),                       # x
                const_spec(pp["w1p"].shape), const_spec(pp["b1p"].shape),
                const_spec(pp["w2p"].shape), const_spec(pp["b2p"].shape),
                const_spec(pp["w_headp"].shape), const_spec(pp["b_headp"].shape),
                const_spec(pp["floor"].shape),
            ],
            out_specs=batch_spec(head_out),
        ),
        compiler_params=pltpu.CompilerParams(
            dimension_semantics=("parallel",),
        ),
    )(xp, pp["w1p"], pp["b1p"], pp["w2p"], pp["b2p"],
      pp["w_headp"], pp["b_headp"], pp["floor"])

    # Wrapper-side split / reshape (free layout plumbing).
    out = out[:N]
    alphas = out[:, :mixture_size]
    means = out[:, mixture_size:mixture_size + tm].reshape(
        N, targets, mixture_size)
    log_sigmas = out[:, mixture_size + tm:].reshape(N, targets, mixture_size)
    return alphas, means, log_sigmas


# ----------------------------------------------------------------------------
# Synthetic params + pure-JAX reference (PyTorch semantics, unfused).
# ----------------------------------------------------------------------------
def init_params(key, input_dim, hidden_dim, mixture_size, targets):
    """Deterministic synthetic parameters (stored [in, out])."""
    tm = targets * mixture_size
    shapes = {
        "w1": (input_dim, hidden_dim), "b1": (1, hidden_dim),
        "w2": (hidden_dim, hidden_dim), "b2": (1, hidden_dim),
        "w3": (hidden_dim, hidden_dim), "b3": (1, hidden_dim),
        "wa": (hidden_dim, mixture_size), "ba": (1, mixture_size),
        "ws": (hidden_dim, tm), "bs": (1, tm),
        "wm": (hidden_dim, tm), "bm": (1, tm),
    }
    params = {}
    keys = jax.random.split(key, len(shapes))
    for k, (name, shp) in zip(keys, sorted(shapes.items())):
        fan_in = shp[0] if name.startswith("w") else shapes["w" + name[1:]][0]
        bound = 1.0 / jnp.sqrt(jnp.float32(fan_in))
        params[name] = jax.random.uniform(
            k, shp, dtype=jnp.float32, minval=-bound, maxval=bound
        )
    return params


def reference_forward(x, params, mixture_size, targets):
    h = jnp.tanh(x @ params["w1"] + params["b1"])
    h = jnp.tanh(h @ params["w2"] + params["b2"])
    h = h @ params["w3"] + params["b3"]
    alphas = h @ params["wa"] + params["ba"]
    raw_sig = (h @ params["ws"] + params["bs"]).reshape(-1, targets, mixture_size)
    means = (h @ params["wm"] + params["bm"]).reshape(-1, targets, mixture_size)
    return alphas, means, jnp.maximum(raw_sig, -5.0) - 5.0


if __name__ == "__main__":
    N = 512
    input_dim = 4
    hidden_dim = 32
    mixture_size = 3
    targets = 2

    key = jax.random.PRNGKey(0)
    kx, kp = jax.random.split(key)
    x = jax.random.normal(kx, (N, input_dim), dtype=jnp.float32)
    params = init_params(kp, input_dim, hidden_dim, mixture_size, targets)

    # One-time weight prep (pads, head concat, w3/b3 fold) outside the
    # per-call forward path.
    prepped = prepare_params(params, mixture_size=mixture_size, targets=targets)
    prepped = jax.tree_util.tree_map(jax.block_until_ready, prepped)

    n_tc = _num_tensorcores()
    fwd = jax.jit(
        functools.partial(
            gmm_forward,
            mixture_size=mixture_size,
            targets=targets,
            block_n=1024,
            num_tensorcores=n_tc,
        )
    )
    alphas, means, log_sigmas = fwd(x, prepped)
    jax.block_until_ready((alphas, means, log_sigmas))

    # Sanity check against the pure-JAX reference (the w3/bias folds only
    # change floating-point association).
    ra, rm, rs = reference_forward(x, params, mixture_size, targets)
    assert alphas.shape == (N, mixture_size)
    assert means.shape == (N, targets, mixture_size)
    assert log_sigmas.shape == (N, targets, mixture_size)
    assert jnp.allclose(alphas, ra, atol=1e-5, rtol=1e-5)
    assert jnp.allclose(means, rm, atol=1e-5, rtol=1e-5)
    assert jnp.allclose(log_sigmas, rs, atol=1e-5, rtol=1e-5)

    print("KERNEL_OK")
</pallas_src>

<mosaic_0001>
module attributes {stable_mosaic.version = 11 : i64} {
  func.func @gmm_fused_kernel(%arg0: i32, %arg1: memref<512x4xf32, #tpu.memory_space<vmem>>, %arg2: memref<4x128xf32, #tpu.memory_space<vmem>>, %arg3: memref<1x128xf32, #tpu.memory_space<vmem>>, %arg4: memref<128x128xf32, #tpu.memory_space<vmem>>, %arg5: memref<1x128xf32, #tpu.memory_space<vmem>>, %arg6: memref<128x15xf32, #tpu.memory_space<vmem>>, %arg7: memref<1x15xf32, #tpu.memory_space<vmem>>, %arg8: memref<1x15xf32, #tpu.memory_space<vmem>>, %arg9: memref<512x15xf32, #tpu.memory_space<vmem>>) attributes {dimension_semantics = [#tpu.dimension_semantics<parallel>], iteration_bounds = array<i64: 1>, scalar_prefetch = 0 : i64, scratch_operands = 0 : i64, tpu.core_type = #tpu.core_type<tc>, window_params = [{transform_indices = @transform_0, window_bounds = array<i64: 512, 4>}, {pipeline_mode = #tpu.pipeline_mode<synchronous>, transform_indices = @transform_1, window_bounds = array<i64: 4, 128>}, {pipeline_mode = #tpu.pipeline_mode<synchronous>, transform_indices = @transform_2, window_bounds = array<i64: 1, 128>}, {pipeline_mode = #tpu.pipeline_mode<synchronous>, transform_indices = @transform_3, window_bounds = array<i64: 128, 128>}, {pipeline_mode = #tpu.pipeline_mode<synchronous>, transform_indices = @transform_4, window_bounds = array<i64: 1, 128>}, {pipeline_mode = #tpu.pipeline_mode<synchronous>, transform_indices = @transform_5, window_bounds = array<i64: 128, 15>}, {pipeline_mode = #tpu.pipeline_mode<synchronous>, transform_indices = @transform_6, window_bounds = array<i64: 1, 15>}, {pipeline_mode = #tpu.pipeline_mode<synchronous>, transform_indices = @transform_7, window_bounds = array<i64: 1, 15>}, {transform_indices = @transform_8, window_bounds = array<i64: 512, 15>}]} {
    %c0 = arith.constant 0 : index
    %c0_0 = arith.constant 0 : index
    %0 = vector.load %arg1[%c0, %c0_0] : memref<512x4xf32, #tpu.memory_space<vmem>>, vector<512x4xf32>
    %c0_1 = arith.constant 0 : index
    %c0_2 = arith.constant 0 : index
    %1 = vector.load %arg2[%c0_1, %c0_2] : memref<4x128xf32, #tpu.memory_space<vmem>>, vector<4x128xf32>
    %cst = arith.constant dense<0.000000e+00> : vector<512x128xf32>
    %2 = tpu.matmul %0, %1, %cst {dimension_numbers = #tpu.dot_dimension_numbers<[1], [0], [0], [1], [0, 0, 1, 1], [], []>} : vector<512x4xf32>, vector<4x128xf32>, vector<512x128xf32> -> vector<512x128xf32>
    %c0_3 = arith.constant 0 : index
    %c0_4 = arith.constant 0 : index
    %3 = vector.load %arg3[%c0_3, %c0_4] : memref<1x128xf32, #tpu.memory_space<vmem>>, vector<1x128xf32>
    %4 = vector.broadcast %3 : vector<1x128xf32> to vector<512x128xf32>
    %5 = arith.addf %2, %4 : vector<512x128xf32>
    %6 = math.tanh %5 : vector<512x128xf32>
    %c0_5 = arith.constant 0 : index
    %c0_6 = arith.constant 0 : index
    %7 = vector.load %arg4[%c0_5, %c0_6] : memref<128x128xf32, #tpu.memory_space<vmem>>, vector<128x128xf32>
    %cst_7 = arith.constant dense<0.000000e+00> : vector<512x128xf32>
    %8 = tpu.matmul %6, %7, %cst_7 {dimension_numbers = #tpu.dot_dimension_numbers<[1], [0], [0], [1], [0, 0, 1, 1], [], []>} : vector<512x128xf32>, vector<128x128xf32>, vector<512x128xf32> -> vector<512x128xf32>
    %c0_8 = arith.constant 0 : index
    %c0_9 = arith.constant 0 : index
    %9 = vector.load %arg5[%c0_8, %c0_9] : memref<1x128xf32, #tpu.memory_space<vmem>>, vector<1x128xf32>
    %10 = vector.broadcast %9 : vector<1x128xf32> to vector<512x128xf32>
    %11 = arith.addf %8, %10 : vector<512x128xf32>
    %12 = math.tanh %11 : vector<512x128xf32>
    %c0_10 = arith.constant 0 : index
    %c0_11 = arith.constant 0 : index
    %13 = vector.load %arg6[%c0_10, %c0_11] : memref<128x15xf32, #tpu.memory_space<vmem>>, vector<128x15xf32>
    %cst_12 = arith.constant dense<0.000000e+00> : vector<512x15xf32>
    %14 = tpu.matmul %12, %13, %cst_12 {dimension_numbers = #tpu.dot_dimension_numbers<[1], [0], [0], [1], [0, 0, 1, 1], [], []>} : vector<512x128xf32>, vector<128x15xf32>, vector<512x15xf32> -> vector<512x15xf32>
    %c0_13 = arith.constant 0 : index
    %c0_14 = arith.constant 0 : index
    %15 = vector.load %arg7[%c0_13, %c0_14] : memref<1x15xf32, #tpu.memory_space<vmem>>, vector<1x15xf32>
    %16 = vector.broadcast %15 : vector<1x15xf32> to vector<512x15xf32>
    %17 = arith.addf %14, %16 : vector<512x15xf32>
    %c0_15 = arith.constant 0 : index
    %c0_16 = arith.constant 0 : index
    %18 = vector.load %arg8[%c0_15, %c0_16] : memref<1x15xf32, #tpu.memory_space<vmem>>, vector<1x15xf32>
    %19 = vector.broadcast %18 : vector<1x15xf32> to vector<512x15xf32>
    %20 = arith.maximumf %17, %19 : vector<512x15xf32>
    %c0_17 = arith.constant 0 : index
    %c0_18 = arith.constant 0 : index
    %21 = vector.load %arg9[%c0_17, %c0_18] : memref<512x15xf32, #tpu.memory_space<vmem>>, vector<512x15xf32>
    tpu.vector_store %arg9[%c0_17, %c0_18], %20 {strides = array<i32>} : memref<512x15xf32, #tpu.memory_space<vmem>>, vector<512x15xf32>,
    return
  }
  func.func @transform_0(%arg0: i32) -> (i32, i32) {
    %c0_i32 = arith.constant 0 : i32
    %c0_i32_0 = arith.constant 0 : i32
    return %arg0, %c0_i32 : i32, i32
  }
  func.func @transform_1(%arg0: i32) -> (i32, i32) {
    %c0_i32 = arith.constant 0 : i32
    %c0_i32_0 = arith.constant 0 : i32
    %c0_i32_1 = arith.constant 0 : i32
    return %c0_i32, %c0_i32_0 : i32, i32
  }
  func.func @transform_2(%arg0: i32) -> (i32, i32) {
    %c0_i32 = arith.constant 0 : i32
    %c0_i32_0 = arith.constant 0 : i32
    %c0_i32_1 = arith.constant 0 : i32
    return %c0_i32, %c0_i32_0 : i32, i32
  }
  func.func @transform_3(%arg0: i32) -> (i32, i32) {
    %c0_i32 = arith.constant 0 : i32
    %c0_i32_0 = arith.constant 0 : i32
    %c0_i32_1 = arith.constant 0 : i32
    return %c0_i32, %c0_i32_0 : i32, i32
  }
  func.func @transform_4(%arg0: i32) -> (i32, i32) {
    %c0_i32 = arith.constant 0 : i32
    %c0_i32_0 = arith.constant 0 : i32
    %c0_i32_1 = arith.constant 0 : i32
    return %c0_i32, %c0_i32_0 : i32, i32
  }
  func.func @transform_5(%arg0: i32) -> (i32, i32) {
    %c0_i32 = arith.constant 0 : i32
    %c0_i32_0 = arith.constant 0 : i32
    %c0_i32_1 = arith.constant 0 : i32
    return %c0_i32, %c0_i32_0 : i32, i32
  }
  func.func @transform_6(%arg0: i32) -> (i32, i32) {
    %c0_i32 = arith.constant 0 : i32
    %c0_i32_0 = arith.constant 0 : i32
    %c0_i32_1 = arith.constant 0 : i32
    return %c0_i32, %c0_i32_0 : i32, i32
  }
  func.func @transform_7(%arg0: i32) -> (i32, i32) {
    %c0_i32 = arith.constant 0 : i32
    %c0_i32_0 = arith.constant 0 : i32
    %c0_i32_1 = arith.constant 0 : i32
    return %c0_i32, %c0_i32_0 : i32, i32
  }
  func.func @transform_8(%arg0: i32) -> (i32, i32) {
    %c0_i32 = arith.constant 0 : i32
    %c0_i32_0 = arith.constant 0 : i32
    return %arg0, %c0_i32 : i32, i32
  }
}

</mosaic_0001>

<bundles_post_ra>
// kernel: gmm_forward.1
= control target key start
LH: loop header
LB: loop body
LE: loop exit
PB: predicated region body
PF: predicated region fallthrough
CT: control target
= control target key end

     0   :  { %vm291_vm0 = vcmask 1043456   ;;  %vm98_vm1 = vcmask 31744   ;;  %vm1158_vm2 = vcmask 121856   ;;  %s2605_s1 = inlined_call_operand.vmem [shape: f32[4,128], index: 1, kind: input, shape index: {}]   ;;  %s2606_s0 = inlined_call_operand.vmem [shape: f32[512,4], index: 0, kind: input, shape index: {}]   ;;  %s2607_s2 = inlined_call_operand.vmem [shape: f32[1,128], index: 2, kind: input, shape index: {}]   ;;  %s2608_s3 = inlined_call_operand.vmem [shape: f32[128,128], index: 3, kind: input, shape index: {}]   ;;  %s2609_s4 = inlined_call_operand.vmem [shape: f32[1,128], index: 4, kind: input, shape index: {}]   ;;  %s2610_s5 = inlined_call_operand.vmem [shape: f32[128,15], index: 5, kind: input, shape index: {}]   ;;  %s2611_s6 = inlined_call_operand.vmem [shape: f32[1,15], index: 6, kind: input, shape index: {}]   ;;  %s2612_s7 = inlined_call_operand.vmem [shape: f32[1,15], index: 7, kind: input, shape index: {}]   ;;  %s2613_s8 = inlined_call_operand.vmem [shape: f32[512,15], index: 8, kind: output, shape index: {}]  }
   0x1   :  { %v93_v0 = vld [vmem:[%s2605_s1] sm:$0xf]  ;;  %v30_v2 = vld [vmem:[%s2606_s0 + $0x8] sm:$0xff]  ;;  %v31_v3 = vld [vmem:[%s2606_s0 + $0x10] sm:$0xff] }
   0x2   :  { %v29_v1 = vld [vmem:[%s2606_s0] sm:$0xff]  ;;  %1227 = vmatpush.msk.msra.mxu0 %vm291_vm0, %v93_v0  ;;  %1292 = vmatpush.msk.msra.mxu3 %vm291_vm0, %v93_v0  ;;  %v32_v4 = vld [vmem:[%s2606_s0 + $0x18] sm:$0xff]  ;;  %v34_v6 = vld [vmem:[%s2606_s0 + $0x28] sm:$0xff] }
   0x3   :  { %1228 = vmatmul.msk.f32.vlgmr.msra.gmra.mxu0 %vm98_vm1, %v29_v1  ;;  %v33_v5 = vld [vmem:[%s2606_s0 + $0x20] sm:$0xff]  ;;  %v35_v7 = vld [vmem:[%s2606_s0 + $0x30] sm:$0xff]  ;;  %v36_v8 = vld [vmem:[%s2606_s0 + $0x38] sm:$0xff] }
   0x4   :  { %v37_v9 = vld [vmem:[%s2606_s0 + $0x40] sm:$0xff]  ;;  %v38_v10 = vld [vmem:[%s2606_s0 + $0x48] sm:$0xff]  ;;  %v583_v11 = vld [vmem:[%s2608_s3 + $0x78] sm:$0xff] }
   0x5   :  { %588 = vmatpush.msra.mxu1 %v583_v11  ;;  %v582_v12 = vld [vmem:[%s2608_s3 + $0x70] sm:$0xff]  ;;  %v581_v13 = vld [vmem:[%s2608_s3 + $0x68] sm:$0xff]  ;;  %1293 = vmatpush.msrb.mxu3 %v583_v11  ;;  %v580_v14 = vld [vmem:[%s2608_s3 + $0x60] sm:$0xff] }
   0x6   :  { %v39_v15 = vld [vmem:[%s2606_s0 + $0x50] sm:$0xff]  ;;  %v579_v16 = vld [vmem:[%s2608_s3 + $0x58] sm:$0xff]  ;;  %v577_v18 = vld [vmem:[%s2608_s3 + $0x48] sm:$0xff] }
   0x7   :  { %589 = vmatpush.msra.mxu1 %v582_v12  ;;  %1294 = vmatpush.msrb.mxu3 %v582_v12  ;;  %v578_v17 = vld [vmem:[%s2608_s3 + $0x50] sm:$0xff]  ;;  %v576_v19 = vld [vmem:[%s2608_s3 + $0x40] sm:$0xff]  ;;  %v40_v20 = vld [vmem:[%s2606_s0 + $0x58] sm:$0xff] }
   0x8   :  { %v575_v21 = vld [vmem:[%s2608_s3 + $0x38] sm:$0xff]  ;;  %v574_v22 = vld [vmem:[%s2608_s3 + $0x30] sm:$0xff]  ;;  %v573_v23 = vld [vmem:[%s2608_s3 + $0x28] sm:$0xff] }
   0x9   :  { %590 = vmatpush.msra.mxu1 %v581_v13  ;;  %1295 = vmatpush.msrb.mxu3 %v581_v13  ;;  %v41_v24 = vld [vmem:[%s2606_s0 + $0x60] sm:$0xff]  ;;  %v571_v26 = vld [vmem:[%s2608_s3 + $0x18] sm:$0xff]  ;;  %v570_v27 = vld [vmem:[%s2608_s3 + $0x10] sm:$0xff] }
   0xa   :  { %v572_v25 = vld [vmem:[%s2608_s3 + $0x20] sm:$0xff]  ;;  %v569_v28 = vld [vmem:[%s2608_s3 + $0x8] sm:$0xff]  ;;  %v43_v31 = vld [vmem:[%s2606_s0 + $0x70] sm:$0xff] }
   0xb   :  { %1229 = vmatmul.msk.f32.gmra.mxu0 %vm98_vm1, %v30_v2  ;;  %591 = vmatpush.msra.mxu1 %v580_v14  ;;  %v42_v29 = vld [vmem:[%s2606_s0 + $0x68] sm:$0xff]  ;;  %v568_v30 = vld [vmem:[%s2608_s3] sm:$0xff]  ;;  %v44_v32 = vld [vmem:[%s2606_s0 + $0x78] sm:$0xff] }
   0xc   :  { %1296 = vmatpush.msrb.mxu3 %v580_v14  ;;  %v1752_v33 = vld [vmem:[%s2607_s2] ss:$0 sm:$0xff]  ;;  %v46_v38 = vld [vmem:[%s2606_s0 + $0x88] sm:$0xff]  ;;  %v47_v42 = vld [vmem:[%s2606_s0 + $0x90] sm:$0xff] }
   0xd   :  { %592 = vmatpush.msra.mxu1 %v579_v16  ;;  %v45_v35 = vld [vmem:[%s2606_s0 + $0x80] sm:$0xff]  ;;  %v48_v46 = vld [vmem:[%s2606_s0 + $0x98] sm:$0xff]  ;;  %v50_v54 = vld [vmem:[%s2606_s0 + $0xa8] sm:$0xff] }
   0xe   :  { %1297 = vmatpush.msrb.mxu3 %v579_v16  ;;  %v49_v50 = vld [vmem:[%s2606_s0 + $0xa0] sm:$0xff]  ;;  %v51_v58 = vld [vmem:[%s2606_s0 + $0xb0] sm:$0xff]  ;;  %v52_v62 = vld [vmem:[%s2606_s0 + $0xb8] sm:$0xff] }
   0xf   :  { %593 = vmatpush.msra.mxu1 %v578_v17  ;;  %v53_v2 = vld [vmem:[%s2606_s0 + $0xc0] sm:$0xff]  ;;  %v1811_v13 = vld [vmem:[%s2610_s5 + $0x78] sm:$0xff]  ;;  %v1818_v14 = vld [vmem:[%s2610_s5 + $0x70] sm:$0xff] }
  0x10   :  { %1298 = vmatpush.msrb.mxu3 %v578_v17  ;;  %881 = vmatpush.msra.mxu2 %v1811_v13  ;;  %v1830_v16 = vld [vmem:[%s2610_s5 + $0x60] sm:$0xff] }
  0x11   :  { %594 = vmatpush.msra.mxu1 %v577_v18 }
  0x12   :  { %1299 = vmatpush.msrb.mxu3 %v577_v18  ;;  %882 = vmatpush.msra.mxu2 %v1818_v14  ;;  %v56_v18 = vld [vmem:[%s2606_s0 + $0xd8] sm:$0xff] }
  0x13   :  { %1230 = vmatmul.msk.f32.gmra.mxu0 %vm98_vm1, %v31_v3  ;;  %595 = vmatpush.msra.mxu1 %v576_v19 }
  0x14   :  { %1300 = vmatpush.msrb.mxu3 %v576_v19 }
  0x15   :  { %596 = vmatpush.msra.mxu1 %v575_v21 }
  0x16   :  { %1301 = vmatpush.msrb.mxu3 %v575_v21  ;;  %v1840_v21 = vld [vmem:[%s2610_s5 + $0x58] sm:$0xff] }
  0x17   :  { %597 = vmatpush.msra.mxu1 %v574_v22 }
  0x18   :  { %1302 = vmatpush.msrb.mxu3 %v574_v22  ;;  %v1847_v22 = vld [vmem:[%s2610_s5 + $0x50] sm:$0xff] }
  0x19   :  { %598 = vmatpush.msra.mxu1 %v573_v23 }
  0x1a   :  { %1303 = vmatpush.msrb.mxu3 %v573_v23  ;;  %v1852_v23 = vld [vmem:[%s2610_s5 + $0x48] sm:$0xff] }
  0x1b   :  { %1231 = vmatmul.msk.f32.gmra.mxu0 %vm98_vm1, %v32_v4  ;;  %599 = vmatpush.msra.mxu1 %v572_v25 }
  0x1c   :  { %1304 = vmatpush.msrb.mxu3 %v572_v25 }
  0x1d   :  { %600 = vmatpush.msra.mxu1 %v571_v26 }
  0x1e   :  { %1305 = vmatpush.msrb.mxu3 %v571_v26  ;;  %v57_v26 = vld [vmem:[%s2606_s0 + $0xe0] sm:$0xff] }
  0x1f   :  { %601 = vmatpush.msra.mxu1 %v570_v27 }
  0x20   :  { %1306 = vmatpush.msrb.mxu3 %v570_v27 }
  0x21   :  { %602 = vmatpush.msra.mxu1 %v569_v28 }
  0x22   :  { %1307 = vmatpush.msrb.mxu3 %v569_v28 }
  0x23   :  { %1232 = vmatmul.msk.f32.gmra.mxu0 %vm98_vm1, %v33_v5  ;;  %603 = vmatpush.msra.mxu1 %v568_v30 }
  0x24   :  { %1308 = vmatpush.msrb.mxu3 %v568_v30  ;;  %v1876_v30 = vld [vmem:[%s2610_s5 + $0x30] sm:$0xff] }
  0x2b   :  { %1233 = vmatmul.msk.f32.gmra.mxu0 %vm98_vm1, %v34_v6  ;;  %v54_v6 = vld [vmem:[%s2606_s0 + $0xc8] sm:$0xff] }
  0x33   :  { %1234 = vmatmul.msk.f32.gmra.mxu0 %vm98_vm1, %v35_v7 }
  0x3b   :  { %1235 = vmatmul.msk.f32.gmra.mxu0 %vm98_vm1, %v36_v8 }
  0x43   :  { %1236 = vmatmul.msk.f32.gmra.mxu0 %vm98_vm1, %v37_v9 }
  0x4b   :  { %1237 = vmatmul.msk.f32.gmra.mxu0 %vm98_vm1, %v38_v10  ;;  %v55_v10 = vld [vmem:[%s2606_s0 + $0xd0] sm:$0xff] }
  0x53   :  { %1238 = vmatmul.msk.f32.gmra.mxu0 %vm98_vm1, %v39_v15  ;;  %v1823_v15 = vld [vmem:[%s2610_s5 + $0x68] sm:$0xff] }
  0x54   :  { %883 = vmatpush.msra.mxu2 %v1823_v15 }
  0x56   :  { %884 = vmatpush.msra.mxu2 %v1830_v16 }
  0x58   :  { %885 = vmatpush.msra.mxu2 %v1840_v21 }
  0x5a   :  { %886 = vmatpush.msra.mxu2 %v1847_v22 }
  0x5b   :  { %1239 = vmatmul.msk.f32.gmra.mxu0 %vm98_vm1, %v40_v20 }
  0x5c   :  { %887 = vmatpush.msra.mxu2 %v1852_v23 }
  0x63   :  { %1240 = vmatmul.msk.f32.gmra.mxu0 %vm98_vm1, %v41_v24  ;;  %v1859_v24 = vld [vmem:[%s2610_s5 + $0x40] sm:$0xff] }
  0x64   :  { %888 = vmatpush.msra.mxu2 %v1859_v24 }
  0x6b   :  { %1241 = vmatmul.msk.f32.gmra.mxu0 %vm98_vm1, %v42_v29  ;;  %v1869_v29 = vld [vmem:[%s2610_s5 + $0x38] sm:$0xff] }
  0x6c   :  { %889 = vmatpush.msra.mxu2 %v1869_v29 }
  0x6e   :  { %890 = vmatpush.msra.mxu2 %v1876_v30 }
  0x73   :  { %1242 = vmatmul.msk.f32.gmra.mxu0 %vm98_vm1, %v43_v31  ;;  %v1881_v31 = vld [vmem:[%s2610_s5 + $0x28] sm:$0xff] }
  0x74   :  { %891 = vmatpush.msra.mxu2 %v1881_v31 }
  0x7b   :  { %1243 = vmatmul.msk.f32.gmra.mxu0 %vm98_vm1, %v44_v32  ;;  %v1888_v32 = vld [vmem:[%s2610_s5 + $0x20] sm:$0xff] }
  0x7c   :  { %892 = vmatpush.msra.mxu2 %v1888_v32 }
  0x80   :  { %v312_v34 = vpop.f32.mrf.mxu0 }
  0x81   :  { %v313_v36 = vadd.f32 %v1752_v33, %v312_v34 }
  0x83   :  { %1329 = vtanh.f32 %v313_v36  ;;  %1244 = vmatmul.msk.f32.gmra.mxu0 %vm98_vm1, %v45_v35  ;;  %v58_v35 = vld [vmem:[%s2606_s0 + $0xe8] sm:$0xff] }
  0x88   :  { %v315_v37 = vpop.f32.mrf.mxu0 }
  0x89   :  { %v1330_v39 = vpop.eup %1329  ;;  %v316_v40 = vadd.f32 %v1752_v33, %v315_v37 }
  0x8a   :  { %604 = vmatmul.f32.vlgmr.msra.gmra.mxu1 %v1330_v39  ;;  %v1905_v39 = vld [vmem:[%s2610_s5 + $0x10] sm:$0xff] }
  0x8b   :  { %1331 = vtanh.f32 %v316_v40  ;;  %1245 = vmatmul.msk.f32.gmra.mxu0 %vm98_vm1, %v46_v38  ;;  %v1898_v38 = vld [vmem:[%s2610_s5 + $0x18] sm:$0xff]  ;;  %v1910_v40 = vld [vmem:[%s2610_s5 + $0x8] sm:$0xff] }
  0x8c   :  { %893 = vmatpush.msra.mxu2 %v1898_v38 }
  0x8e   :  { %894 = vmatpush.msra.mxu2 %v1905_v39 }
  0x90   :  { %v318_v41 = vpop.f32.mrf.mxu0  ;;  %895 = vmatpush.msra.mxu2 %v1910_v40 }
  0x91   :  { %v1332_v43 = vpop.eup %1331  ;;  %v319_v44 = vadd.f32 %v1752_v33, %v318_v41  ;;  %v1917_v41 = vld [vmem:[%s2610_s5] sm:$0xff] }
  0x92   :  { %607 = vmatmul.f32.gmra.mxu1 %v1332_v43  ;;  %v59_v43 = vld [vmem:[%s2606_s0 + $0xf0] sm:$0xff]  ;;  %896 = vmatpush.msra.mxu2 %v1917_v41 }
  0x93   :  { %1333 = vtanh.f32 %v319_v44  ;;  %1246 = vmatmul.msk.f32.gmra.mxu0 %vm98_vm1, %v47_v42 }
  0x98   :  { %v321_v45 = vpop.f32.mrf.mxu0 }
  0x99   :  { %v1334_v47 = vpop.eup %1333  ;;  %v322_v48 = vadd.f32 %v1752_v33, %v321_v45 }
  0x9a   :  { %610 = vmatmul.f32.gmra.mxu1 %v1334_v47  ;;  %v60_v47 = vld [vmem:[%s2606_s0 + $0xf8] sm:$0xff] }
  0x9b   :  { %1335 = vtanh.f32 %v322_v48  ;;  %1247 = vmatmul.msk.f32.gmra.mxu0 %vm98_vm1, %v48_v46 }
  0xa0   :  { %v324_v49 = vpop.f32.mrf.mxu0 }
  0xa1   :  { %v1336_v51 = vpop.eup %1335  ;;  %v325_v52 = vadd.f32 %v1752_v33, %v324_v49 }
  0xa2   :  { %613 = vmatmul.f32.gmra.mxu1 %v1336_v51  ;;  %v61_v51 = vld [vmem:[%s2606_s0 + $0x100] sm:$0xff] }
  0xa3   :  { %1337 = vtanh.f32 %v325_v52  ;;  %1248 = vmatmul.msk.f32.gmra.mxu0 %vm98_vm1, %v49_v50 }
  0xa8   :  { %v327_v53 = vpop.f32.mrf.mxu0 }
  0xa9   :  { %v1338_v55 = vpop.eup %1337  ;;  %v328_v56 = vadd.f32 %v1752_v33, %v327_v53 }
  0xaa   :  { %616 = vmatmul.f32.gmra.mxu1 %v1338_v55 }
  0xab   :  { %1339 = vtanh.f32 %v328_v56  ;;  %1249 = vmatmul.msk.f32.gmra.mxu0 %vm98_vm1, %v50_v54  ;;  %v1938_v54 = vld [vmem:[%s2609_s4] ss:$0 sm:$0xff] }
  0xb0   :  { %v330_v57 = vpop.f32.mrf.mxu0 }
  0xb1   :  { %v1340_v59 = vpop.eup %1339  ;;  %v331_v60 = vadd.f32 %v1752_v33, %v330_v57 }
  0xb2   :  { %619 = vmatmul.f32.gmra.mxu1 %v1340_v59 }
  0xb3   :  { %1341 = vtanh.f32 %v331_v60  ;;  %1250 = vmatmul.msk.f32.gmra.mxu0 %vm98_vm1, %v51_v58  ;;  %v62_v58 = vld [vmem:[%s2606_s0 + $0x108] sm:$0xff] }
  0xb8   :  { %v333_v61 = vpop.f32.mrf.mxu0 }
  0xb9   :  { %v1342_v63 = vpop.eup %1341  ;;  %v334_v0 = vadd.f32 %v1752_v33, %v333_v61 }
  0xba   :  { %622 = vmatmul.f32.gmra.mxu1 %v1342_v63 }
  0xbb   :  { %1343 = vtanh.f32 %v334_v0  ;;  %1251 = vmatmul.msk.f32.gmra.mxu0 %vm98_vm1, %v52_v62 }
  0xc0   :  { %v336_v1 = vpop.f32.mrf.mxu0 }
  0xc1   :  { %v1344_v3 = vpop.eup %1343  ;;  %v337_v4 = vadd.f32 %v1752_v33, %v336_v1  ;;  %v63_v1 = vld [vmem:[%s2606_s0 + $0x110] sm:$0xff] }
  0xc2   :  { %625 = vmatmul.f32.gmra.mxu1 %v1344_v3 }
  0xc3   :  { %1345 = vtanh.f32 %v337_v4  ;;  %1252 = vmatmul.msk.f32.gmra.mxu0 %vm98_vm1, %v53_v2 }
  0xc8   :  { %v339_v5 = vpop.f32.mrf.mxu0 }
  0xc9   :  { %v1346_v7 = vpop.eup %1345  ;;  %v340_v8 = vadd.f32 %v1752_v33, %v339_v5 }
  0xca   :  { %628 = vmatmul.f32.gmra.mxu1 %v1346_v7 }
  0xcb   :  { %1347 = vtanh.f32 %v340_v8  ;;  %1253 = vmatmul.msk.f32.gmra.mxu0 %vm98_vm1, %v54_v6  ;;  %v64_v8 = vld [vmem:[%s2606_s0 + $0x118] sm:$0xff] }
  0xd0   :  { %v342_v9 = vpop.f32.mrf.mxu0 }
  0xd1   :  { %v1348_v11 = vpop.eup %1347  ;;  %v343_v12 = vadd.f32 %v1752_v33, %v342_v9 }
  0xd2   :  { %631 = vmatmul.f32.gmra.mxu1 %v1348_v11 }
  0xd3   :  { %1349 = vtanh.f32 %v343_v12  ;;  %1254 = vmatmul.msk.f32.gmra.mxu0 %vm98_vm1, %v55_v10 }
  0xd8   :  { %v345_v17 = vpop.f32.mrf.mxu0 }
  0xd9   :  { %v1350_v19 = vpop.eup %1349  ;;  %v346_v20 = vadd.f32 %v1752_v33, %v345_v17 }
  0xda   :  { %634 = vmatmul.f32.gmra.mxu1 %v1350_v19  ;;  %v65_v19 = vld [vmem:[%s2606_s0 + $0x120] sm:$0xff] }
  0xdb   :  { %1351 = vtanh.f32 %v346_v20  ;;  %1255 = vmatmul.msk.f32.gmra.mxu0 %vm98_vm1, %v56_v18 }
  0xe0   :  { %v348_v25 = vpop.f32.mrf.mxu0 }
  0xe1   :  { %v1352_v27 = vpop.eup %1351  ;;  %v349_v28 = vadd.f32 %v1752_v33, %v348_v25 }
  0xe2   :  { %637 = vmatmul.f32.gmra.mxu1 %v1352_v27 }
  0xe3   :  { %1353 = vtanh.f32 %v349_v28  ;;  %1256 = vmatmul.msk.f32.gmra.mxu0 %vm98_vm1, %v57_v26 }
  0xe8   :  { %v351_v34 = vpop.f32.mrf.mxu0 }
  0xe9   :  { %v1354_v36 = vpop.eup %1353  ;;  %v352_v37 = vadd.f32 %v1752_v33, %v351_v34 }
  0xea   :  { %640 = vmatmul.f32.gmra.mxu1 %v1354_v36 }
  0xeb   :  { %1355 = vtanh.f32 %v352_v37  ;;  %1257 = vmatmul.msk.f32.gmra.mxu0 %vm98_vm1, %v58_v35  ;;  %v66_v35 = vld [vmem:[%s2606_s0 + $0x128] sm:$0xff] }
  0xf0   :  { %v354_v42 = vpop.f32.mrf.mxu0 }
  0xf1   :  { %v1356_v44 = vpop.eup %1355  ;;  %v355_v45 = vadd.f32 %v1752_v33, %v354_v42 }
  0xf2   :  { %643 = vmatmul.f32.gmra.mxu1 %v1356_v44 }
  0xf3   :  { %1357 = vtanh.f32 %v355_v45  ;;  %1258 = vmatmul.msk.f32.gmra.mxu0 %vm98_vm1, %v59_v43 }
  0xf8   :  { %v357_v46 = vpop.f32.mrf.mxu0 }
  0xf9   :  { %v1358_v48 = vpop.eup %1357  ;;  %v358_v49 = vadd.f32 %v1752_v33, %v357_v46  ;;  %v67_v46 = vld [vmem:[%s2606_s0 + $0x130] sm:$0xff] }
  0xfa   :  { %646 = vmatmul.f32.gmra.mxu1 %v1358_v48 }
  0xfb   :  { %1359 = vtanh.f32 %v358_v49  ;;  %1259 = vmatmul.msk.f32.gmra.mxu0 %vm98_vm1, %v60_v47 }
 0x100   :  { %v360_v50 = vpop.f32.mrf.mxu0 }
 0x101   :  { %v1360_v52 = vpop.eup %1359  ;;  %v361_v53 = vadd.f32 %v1752_v33, %v360_v50 }
 0x102   :  { %649 = vmatmul.f32.gmra.mxu1 %v1360_v52 }
 0x103   :  { %1361 = vtanh.f32 %v361_v53  ;;  %1260 = vmatmul.msk.f32.gmra.mxu0 %vm98_vm1, %v61_v51  ;;  %v68_v53 = vld [vmem:[%s2606_s0 + $0x138] sm:$0xff] }
 0x107   :  { %v605_v55 = vpop.f32.mrf.mxu1 }
 0x108   :  { %v606_v56 = vadd.f32 %v1938_v54, %v605_v55  ;;  %v363_v57 = vpop.f32.mrf.mxu0 }
 0x109   :  { %v1362_v59 = vpop.eup %1361  ;;  %v364_v60 = vadd.f32 %v1752_v33, %v363_v57 }
 0x10a   :  { %1363 = vtanh.f32 %v606_v56  ;;  %652 = vmatmul.f32.gmra.mxu1 %v1362_v59 }
 0x10b   :  { %1365 = vtanh.f32 %v364_v60  ;;  %1261 = vmatmul.msk.f32.gmra.mxu0 %vm98_vm1, %v62_v58 }
 0x10f   :  { %v608_v61 = vpop.f32.mrf.mxu1 }
 0x110   :  { %v1364_v62 = vpop.eup %1363  ;;  %v609_v63 = vadd.f32 %v1938_v54, %v608_v61  ;;  %v366_v0 = vpop.f32.mrf.mxu0  ;;  %v69_v61 = vld [vmem:[%s2606_s0 + $0x140] sm:$0xff] }
 0x111   :  { %v1366_v2 = vpop.eup %1365  ;;  %v367_v3 = vadd.f32 %v1752_v33, %v366_v0  ;;  %897 = vmatmul.f32.vlgmr.msra.gmra.mxu2 %v1364_v62 }
 0x112   :  { %1367 = vtanh.f32 %v609_v63  ;;  %655 = vmatmul.f32.gmra.mxu1 %v1366_v2 }
 0x113   :  { %1369 = vtanh.f32 %v367_v3  ;;  %1262 = vmatmul.msk.f32.gmra.mxu0 %vm98_vm1, %v63_v1 }
 0x117   :  { %v611_v4 = vpop.f32.mrf.mxu1 }
 0x118   :  { %v1368_v5 = vpop.eup %1367  ;;  %v612_v6 = vadd.f32 %v1938_v54, %v611_v4  ;;  %v369_v7 = vpop.f32.mrf.mxu0  ;;  %v70_v4 = vld [vmem:[%s2606_s0 + $0x148] sm:$0xff] }
 0x119   :  { %v1370_v9 = vpop.eup %1369  ;;  %v370_v10 = vadd.f32 %v1752_v33, %v369_v7  ;;  %900 = vmatmul.f32.gmra.mxu2 %v1368_v5 }
 0x11a   :  { %1371 = vtanh.f32 %v612_v6  ;;  %658 = vmatmul.f32.gmra.mxu1 %v1370_v9 }
 0x11b   :  { %1373 = vtanh.f32 %v370_v10  ;;  %1263 = vmatmul.msk.f32.gmra.mxu0 %vm98_vm1, %v64_v8 }
 0x11f   :  { %v614_v11 = vpop.f32.mrf.mxu1 }
 0x120   :  { %v1372_v12 = vpop.eup %1371  ;;  %v615_v17 = vadd.f32 %v1938_v54, %v614_v11  ;;  %v372_v18 = vpop.f32.mrf.mxu0  ;;  %v71_v11 = vld [vmem:[%s2606_s0 + $0x150] sm:$0xff] }
 0x121   :  { %v1374_v20 = vpop.eup %1373  ;;  %v373_v25 = vadd.f32 %v1752_v33, %v372_v18  ;;  %903 = vmatmul.f32.gmra.mxu2 %v1372_v12 }
 0x122   :  { %1375 = vtanh.f32 %v615_v17  ;;  %661 = vmatmul.f32.gmra.mxu1 %v1374_v20 }
 0x123   :  { %1377 = vtanh.f32 %v373_v25  ;;  %1264 = vmatmul.msk.f32.gmra.mxu0 %vm98_vm1, %v65_v19 }
 0x127   :  { %v617_v26 = vpop.f32.mrf.mxu1 }
 0x128   :  { %v1376_v27 = vpop.eup %1375  ;;  %v618_v28 = vadd.f32 %v1938_v54, %v617_v26  ;;  %v375_v34 = vpop.f32.mrf.mxu0  ;;  %v72_v26 = vld [vmem:[%s2606_s0 + $0x158] sm:$0xff] }
 0x129   :  { %v1378_v36 = vpop.eup %1377  ;;  %v376_v37 = vadd.f32 %v1752_v33, %v375_v34  ;;  %906 = vmatmul.f32.gmra.mxu2 %v1376_v27 }
 0x12a   :  { %1379 = vtanh.f32 %v618_v28  ;;  %664 = vmatmul.f32.gmra.mxu1 %v1378_v36 }
 0x12b   :  { %1381 = vtanh.f32 %v376_v37  ;;  %1265 = vmatmul.msk.f32.gmra.mxu0 %vm98_vm1, %v66_v35 }
 0x12f   :  { %v620_v42 = vpop.f32.mrf.mxu1 }
 0x130   :  { %v1380_v43 = vpop.eup %1379  ;;  %v621_v44 = vadd.f32 %v1938_v54, %v620_v42  ;;  %v378_v45 = vpop.f32.mrf.mxu0  ;;  %v73_v42 = vld [vmem:[%s2606_s0 + $0x160] sm:$0xff] }
 0x131   :  { %v1382_v47 = vpop.eup %1381  ;;  %v379_v48 = vadd.f32 %v1752_v33, %v378_v45  ;;  %909 = vmatmul.f32.gmra.mxu2 %v1380_v43 }
 0x132   :  { %1383 = vtanh.f32 %v621_v44  ;;  %667 = vmatmul.f32.gmra.mxu1 %v1382_v47 }
 0x133   :  { %1385 = vtanh.f32 %v379_v48  ;;  %1266 = vmatmul.msk.f32.gmra.mxu0 %vm98_vm1, %v67_v46 }
 0x137   :  { %v623_v49 = vpop.f32.mrf.mxu1 }
 0x138   :  { %v1384_v50 = vpop.eup %1383  ;;  %v624_v51 = vadd.f32 %v1938_v54, %v623_v49  ;;  %v381_v52 = vpop.f32.mrf.mxu0  ;;  %v74_v49 = vld [vmem:[%s2606_s0 + $0x168] sm:$0xff] }
 0x139   :  { %v1386_v55 = vpop.eup %1385  ;;  %v382_v56 = vadd.f32 %v1752_v33, %v381_v52  ;;  %912 = vmatmul.f32.gmra.mxu2 %v1384_v50  ;;  %v79_v52 = vld [vmem:[%s2606_s0 + $0x190] sm:$0xff] }
 0x13a   :  { %1387 = vtanh.f32 %v624_v51  ;;  %670 = vmatmul.f32.gmra.mxu1 %v1386_v55  ;;  %1278 = vmatmul.msk.f32.vlgmr.msra.gmra.mxu3 %vm98_vm1, %v79_v52  ;;  %v86_v52 = vld [vmem:[%s2606_s0 + $0x1c8] sm:$0xff] }
 0x13b   :  { %1389 = vtanh.f32 %v382_v56  ;;  %1267 = vmatmul.msk.f32.gmra.mxu0 %vm98_vm1, %v68_v53  ;;  %1309 = vmatpush.msra.mxu3 %v1811_v13  ;;  %v80_v13 = vld [vmem:[%s2606_s0 + $0x198] sm:$0xff] }
 0x13d   :  { %1310 = vmatpush.msra.mxu3 %v1818_v14 }
 0x13f   :  { %v626_v57 = vpop.f32.mrf.mxu1  ;;  %1311 = vmatpush.msra.mxu3 %v1823_v15 }
 0x140   :  { %v1388_v58 = vpop.eup %1387  ;;  %v627_v59 = vadd.f32 %v1938_v54, %v626_v57  ;;  %v384_v60 = vpop.f32.mrf.mxu0 }
 0x141   :  { %v1390_v62 = vpop.eup %1389  ;;  %v385_v63 = vadd.f32 %v1752_v33, %v384_v60  ;;  %915 = vmatmul.f32.gmra.mxu2 %v1388_v58  ;;  %v75_v58 = vld [vmem:[%s2606_s0 + $0x170] sm:$0xff]  ;;  %1312 = vmatpush.msra.mxu3 %v1830_v16 }
 0x142   :  { %1391 = vtanh.f32 %v627_v59  ;;  %673 = vmatmul.f32.gmra.mxu1 %v1390_v62  ;;  %1279 = vmatmul.msk.f32.gmra.mxu3 %vm98_vm1, %v80_v13 }
 0x143   :  { %1393 = vtanh.f32 %v385_v63  ;;  %1268 = vmatmul.msk.f32.gmra.mxu0 %vm98_vm1, %v69_v61  ;;  %1313 = vmatpush.msra.mxu3 %v1840_v21  ;;  %v76_v63 = vld [vmem:[%s2606_s0 + $0x178] sm:$0xff]  ;;  %v81_v21 = vld [vmem:[%s2606_s0 + $0x1a0] sm:$0xff] }
 0x145   :  { %1314 = vmatpush.msra.mxu3 %v1847_v22 }
 0x147   :  { %v629_v0 = vpop.f32.mrf.mxu1  ;;  %1315 = vmatpush.msra.mxu3 %v1852_v23  ;;  %v77_v23 = vld [vmem:[%s2606_s0 + $0x180] sm:$0xff] }
 0x148   :  { %v1392_v1 = vpop.eup %1391  ;;  %v630_v2 = vadd.f32 %v1938_v54, %v629_v0  ;;  %v387_v3 = vpop.f32.mrf.mxu0 }
 0x149   :  { %v1394_v5 = vpop.eup %1393  ;;  %v388_v6 = vadd.f32 %v1752_v33, %v387_v3  ;;  %918 = vmatmul.f32.gmra.mxu2 %v1392_v1  ;;  %1316 = vmatpush.msra.mxu3 %v1859_v24  ;;  %v82_v24 = vld [vmem:[%s2606_s0 + $0x1a8] sm:$0xff] }
 0x14a   :  { %1395 = vtanh.f32 %v630_v2  ;;  %676 = vmatmul.f32.gmra.mxu1 %v1394_v5  ;;  %1280 = vmatmul.msk.f32.gmra.mxu3 %vm98_vm1, %v81_v21 }
 0x14b   :  { %1397 = vtanh.f32 %v388_v6  ;;  %1269 = vmatmul.msk.f32.gmra.mxu0 %vm98_vm1, %v70_v4  ;;  %1317 = vmatpush.msra.mxu3 %v1869_v29 }
 0x14d   :  { %1318 = vmatpush.msra.mxu3 %v1876_v30 }
 0x14f   :  { %v632_v7 = vpop.f32.mrf.mxu1  ;;  %1319 = vmatpush.msra.mxu3 %v1881_v31  ;;  %v78_v31 = vld [vmem:[%s2606_s0 + $0x188] sm:$0xff] }
 0x150   :  { %v1396_v8 = vpop.eup %1395  ;;  %v633_v9 = vadd.f32 %v1938_v54, %v632_v7  ;;  %v390_v10 = vpop.f32.mrf.mxu0 }
 0x151   :  { %v1398_v12 = vpop.eup %1397  ;;  %v391_v17 = vadd.f32 %v1752_v33, %v390_v10  ;;  %921 = vmatmul.f32.gmra.mxu2 %v1396_v8  ;;  %1320 = vmatpush.msra.mxu3 %v1888_v32  ;;  %v83_v32 = vld [vmem:[%s2606_s0 + $0x1b0] sm:$0xff] }
 0x152   :  { %1399 = vtanh.f32 %v633_v9  ;;  %679 = vmatmul.f32.gmra.mxu1 %v1398_v12  ;;  %1281 = vmatmul.msk.f32.gmra.mxu3 %vm98_vm1, %v82_v24 }
 0x153   :  { %1401 = vtanh.f32 %v391_v17  ;;  %1270 = vmatmul.msk.f32.gmra.mxu0 %vm98_vm1, %v71_v11  ;;  %1321 = vmatpush.msra.mxu3 %v1898_v38 }
 0x155   :  { %1322 = vmatpush.msra.mxu3 %v1905_v39 }
 0x157   :  { %v635_v18 = vpop.f32.mrf.mxu1  ;;  %1323 = vmatpush.msra.mxu3 %v1910_v40  ;;  %v2083_v40 = vld [vmem:[%s2611_s6] ss:$0 sm:$0xff] }
 0x158   :  { %v1400_v19 = vpop.eup %1399  ;;  %v636_v20 = vadd.f32 %v1938_v54, %v635_v18  ;;  %v393_v25 = vpop.f32.mrf.mxu0 }
 0x159   :  { %v1402_v27 = vpop.eup %1401  ;;  %v394_v28 = vadd.f32 %v1752_v33, %v393_v25  ;;  %924 = vmatmul.f32.gmra.mxu2 %v1400_v19  ;;  %1324 = vmatpush.msra.mxu3 %v1917_v41  ;;  %v2088_v41 = vld [vmem:[%s2612_s7] ss:$0 sm:$0xff]  ;;  %v84_v19 = vld [vmem:[%s2606_s0 + $0x1b8] sm:$0xff] }
 0x15a   :  { %1403 = vtanh.f32 %v636_v20  ;;  %682 = vmatmul.f32.gmra.mxu1 %v1402_v27  ;;  %1282 = vmatmul.msk.f32.gmra.mxu3 %vm98_vm1, %v83_v32 }
 0x15b   :  { %1405 = vtanh.f32 %v394_v28  ;;  %1271 = vmatmul.msk.f32.gmra.mxu0 %vm98_vm1, %v72_v26 }
 0x15f   :  { %v638_v34 = vpop.f32.mrf.mxu1 }
 0x160   :  { %v1404_v35 = vpop.eup %1403  ;;  %v639_v36 = vadd.f32 %v1938_v54, %v638_v34  ;;  %v396_v37 = vpop.f32.mrf.mxu0 }
 0x161   :  { %v1406_v43 = vpop.eup %1405  ;;  %v397_v44 = vadd.f32 %v1752_v33, %v396_v37  ;;  %927 = vmatmul.f32.gmra.mxu2 %v1404_v35 }
 0x162   :  { %1407 = vtanh.f32 %v639_v36  ;;  %685 = vmatmul.f32.gmra.mxu1 %v1406_v43  ;;  %1283 = vmatmul.msk.f32.gmra.mxu3 %vm98_vm1, %v84_v19  ;;  %v90_v19 = vld [vmem:[%s2606_s0 + $0x1e8] sm:$0xff] }
 0x163   :  { %1409 = vtanh.f32 %v397_v44  ;;  %1272 = vmatmul.msk.f32.gmra.mxu0 %vm98_vm1, %v73_v42  ;;  %v85_v42 = vld [vmem:[%s2606_s0 + $0x1c0] sm:$0xff] }
 0x167   :  { %v641_v45 = vpop.f32.mrf.mxu1 }
 0x168   :  { %v1408_v46 = vpop.eup %1407  ;;  %v642_v47 = vadd.f32 %v1938_v54, %v641_v45  ;;  %v399_v48 = vpop.f32.mrf.mxu0 }
 0x169   :  { %v1410_v50 = vpop.eup %1409  ;;  %v400_v51 = vadd.f32 %v1752_v33, %v399_v48  ;;  %930 = vmatmul.f32.gmra.mxu2 %v1408_v46 }
 0x16a   :  { %1411 = vtanh.f32 %v642_v47  ;;  %688 = vmatmul.f32.gmra.mxu1 %v1410_v50  ;;  %1284 = vmatmul.msk.f32.gmra.mxu3 %vm98_vm1, %v85_v42  ;;  %v91_v42 = vld [vmem:[%s2606_s0 + $0x1f0] sm:$0xff] }
 0x16b   :  { %1413 = vtanh.f32 %v400_v51  ;;  %1273 = vmatmul.msk.f32.gmra.mxu0 %vm98_vm1, %v74_v49 }
 0x16f   :  { %v644_v53 = vpop.f32.mrf.mxu1 }
 0x170   :  { %v1412_v55 = vpop.eup %1411  ;;  %v645_v56 = vadd.f32 %v1938_v54, %v644_v53  ;;  %v402_v57 = vpop.f32.mrf.mxu0 }
 0x171   :  { %v1414_v59 = vpop.eup %1413  ;;  %v403_v60 = vadd.f32 %v1752_v33, %v402_v57  ;;  %933 = vmatmul.f32.gmra.mxu2 %v1412_v55 }
 0x172   :  { %1415 = vtanh.f32 %v645_v56  ;;  %691 = vmatmul.f32.gmra.mxu1 %v1414_v59  ;;  %1285 = vmatmul.msk.f32.gmra.mxu3 %vm98_vm1, %v86_v52  ;;  %v92_v52 = vld [vmem:[%s2606_s0 + $0x1f8] sm:$0xff] }
 0x173   :  { %1417 = vtanh.f32 %v403_v60  ;;  %1274 = vmatmul.msk.f32.gmra.mxu0 %vm98_vm1, %v75_v58 }
 0x177   :  { %v647_v14 = vpop.f32.mrf.mxu1 }
 0x178   :  { %v1416_v61 = vpop.eup %1415  ;;  %v648_v62 = vadd.f32 %v1938_v54, %v647_v14  ;;  %v405_v15 = vpop.f32.mrf.mxu0 }
 0x179   :  { %v1418_v16 = vpop.eup %1417  ;;  %v406_v0 = vadd.f32 %v1752_v33, %v405_v15  ;;  %936 = vmatmul.f32.gmra.mxu2 %v1416_v61  ;;  %v87_v61 = vld [vmem:[%s2606_s0 + $0x1d0] sm:$0xff] }
 0x17a   :  { %1419 = vtanh.f32 %v648_v62  ;;  %694 = vmatmul.f32.gmra.mxu1 %v1418_v16  ;;  %1286 = vmatmul.msk.f32.gmra.mxu3 %vm98_vm1, %v87_v61 }
 0x17b   :  { %1421 = vtanh.f32 %v406_v0  ;;  %1275 = vmatmul.msk.f32.gmra.mxu0 %vm98_vm1, %v76_v63 }
 0x17f   :  { %v650_v22 = vpop.f32.mrf.mxu1 }
 0x180   :  { %v1420_v1 = vpop.eup %1419  ;;  %v651_v2 = vadd.f32 %v1938_v54, %v650_v22  ;;  %v408_v3 = vpop.f32.mrf.mxu0 }
 0x181   :  { %v1422_v4 = vpop.eup %1421  ;;  %v409_v5 = vadd.f32 %v1752_v33, %v408_v3  ;;  %939 = vmatmul.f32.gmra.mxu2 %v1420_v1  ;;  %v88_v3 = vld [vmem:[%s2606_s0 + $0x1d8] sm:$0xff] }
 0x182   :  { %1423 = vtanh.f32 %v651_v2  ;;  %697 = vmatmul.f32.gmra.mxu1 %v1422_v4  ;;  %1287 = vmatmul.msk.f32.gmra.mxu3 %vm98_vm1, %v88_v3 }
 0x183   :  { %1425 = vtanh.f32 %v409_v5  ;;  %1276 = vmatmul.msk.f32.gmra.mxu0 %vm98_vm1, %v77_v23 }
 0x187   :  { %v653_v29 = vpop.f32.mrf.mxu1 }
 0x188   :  { %v1424_v30 = vpop.eup %1423  ;;  %v654_v6 = vadd.f32 %v1938_v54, %v653_v29  ;;  %v411_v7 = vpop.f32.mrf.mxu0 }
 0x189   :  { %v1426_v8 = vpop.eup %1425  ;;  %v412_v9 = vadd.f32 %v1752_v33, %v411_v7  ;;  %942 = vmatmul.f32.gmra.mxu2 %v1424_v30 }
 0x18a   :  { %1427 = vtanh.f32 %v654_v6  ;;  %700 = vmatmul.f32.gmra.mxu1 %v1426_v8  ;;  %v89_v8 = vld [vmem:[%s2606_s0 + $0x1e0] sm:$0xff] }
 0x18b   :  { %1429 = vtanh.f32 %v412_v9  ;;  %1277 = vmatmul.msk.f32.gmra.mxu0 %vm98_vm1, %v78_v31  ;;  %1288 = vmatmul.msk.f32.gmra.mxu3 %vm98_vm1, %v89_v8 }
 0x18f   :  { %v656_v38 = vpop.f32.mrf.mxu1 }
 0x190   :  { %v1428_v39 = vpop.eup %1427  ;;  %v657_v10 = vadd.f32 %v1938_v54, %v656_v38  ;;  %v414_v11 = vpop.f32.mrf.mxu0 }
 0x191   :  { %v1430_v12 = vpop.eup %1429  ;;  %v415_v17 = vadd.f32 %v1752_v33, %v414_v11  ;;  %945 = vmatmul.f32.gmra.mxu2 %v1428_v39 }
 0x192   :  { %1431 = vtanh.f32 %v657_v10  ;;  %703 = vmatmul.f32.gmra.mxu1 %v1430_v12 }
 0x193   :  { %1433 = vtanh.f32 %v415_v17  ;;  %1289 = vmatmul.msk.f32.gmra.mxu3 %vm98_vm1, %v90_v19 }
 0x194   :  { %v898_v18 = vpop.f32.mrf.mxu2 }
 0x195   :  { %v899_v20 = vadd.f32 %v2083_v40, %v898_v18 }
 0x197   :  { %v1094_v25 = vmax.f32 %v899_v20, %v2088_v41  ;;  %v659_v26 = vpop.f32.mrf.mxu1 }
 0x198   :  { %v1432_v27 = vpop.eup %1431  ;;  %v660_v28 = vadd.f32 %v1938_v54, %v659_v26  ;;  %v417_v34 = vpop.f32.mrf.mxu0 }
 0x199   :  { %v1434_v35 = vpop.eup %1433  ;;  %1159 = vst.msk [vmem:[%s2613_s8] sm:$0xff] %vm1158_vm2, %v1094_v25  ;;  %v418_v36 = vadd.f32 %v1752_v33, %v417_v34  ;;  %948 = vmatmul.f32.gmra.mxu2 %v1432_v27 }
 0x19a   :  { %1435 = vtanh.f32 %v660_v28  ;;  %706 = vmatmul.f32.gmra.mxu1 %v1434_v35 }
 0x19b   :  { %1437 = vtanh.f32 %v418_v36  ;;  %1290 = vmatmul.msk.f32.gmra.mxu3 %vm98_vm1, %v91_v42 }
 0x19c   :  { %v901_v37 = vpop.f32.mrf.mxu2 }
 0x19d   :  { %v902_v43 = vadd.f32 %v2083_v40, %v901_v37 }
 0x19f   :  { %v1095_v44 = vmax.f32 %v902_v43, %v2088_v41  ;;  %v662_v45 = vpop.f32.mrf.mxu1 }
 0x1a0   :  { %v1436_v46 = vpop.eup %1435  ;;  %v663_v47 = vadd.f32 %v1938_v54, %v662_v45  ;;  %v420_v48 = vpop.f32.mrf.mxu0 }
 0x1a1   :  { %v1438_v49 = vpop.eup %1437  ;;  %1160 = vst.msk [vmem:[%s2613_s8 + $0x8] sm:$0xff] %vm1158_vm2, %v1095_v44  ;;  %v421_v50 = vadd.f32 %v1752_v33, %v420_v48  ;;  %951 = vmatmul.f32.gmra.mxu2 %v1436_v46 }
 0x1a2   :  { %1439 = vtanh.f32 %v663_v47  ;;  %709 = vmatmul.f32.gmra.mxu1 %v1438_v49  ;;  %v2188_v49 = vld [vmem:[%s2607_s2] ss:$0 sm:$0xff] }
 0x1a3   :  { %1441 = vtanh.f32 %v421_v50  ;;  %1291 = vmatmul.msk.f32.gmra.mxu3 %vm98_vm1, %v92_v52 }
 0x1a4   :  { %v904_v51 = vpop.f32.mrf.mxu2 }
 0x1a5   :  { %v905_v53 = vadd.f32 %v2083_v40, %v904_v51 }
 0x1a7   :  { %v1096_v55 = vmax.f32 %v905_v53, %v2088_v41  ;;  %v665_v56 = vpop.f32.mrf.mxu1 }
 0x1a8   :  { %v1440_v57 = vpop.eup %1439  ;;  %v666_v58 = vadd.f32 %v1938_v54, %v665_v56  ;;  %v423_v59 = vpop.f32.mrf.mxu0 }
 0x1a9   :  { %v1442_v60 = vpop.eup %1441  ;;  %1161 = vst.msk [vmem:[%s2613_s8 + $0x10] sm:$0xff] %vm1158_vm2, %v1096_v55  ;;  %v424_v13 = vadd.f32 %v1752_v33, %v423_v59  ;;  %954 = vmatmul.f32.gmra.mxu2 %v1440_v57 }
 0x1aa   :  { %1443 = vtanh.f32 %v666_v58  ;;  %712 = vmatmul.f32.gmra.mxu1 %v1442_v60 }
 0x1ab   :  { %1445 = vtanh.f32 %v424_v13 }
 0x1ac   :  { %v907_v14 = vpop.f32.mrf.mxu2 }
 0x1ad   :  { %v908_v62 = vadd.f32 %v2083_v40, %v907_v14 }
 0x1af   :  { %v1097_v15 = vmax.f32 %v908_v62, %v2088_v41  ;;  %v668_v63 = vpop.f32.mrf.mxu1 }
 0x1b0   :  { %v1444_v16 = vpop.eup %1443  ;;  %v669_v0 = vadd.f32 %v1938_v54, %v668_v63  ;;  %v426_v21 = vpop.f32.mrf.mxu0 }
 0x1b1   :  { %v1446_v22 = vpop.eup %1445  ;;  %1162 = vst.msk [vmem:[%s2613_s8 + $0x18] sm:$0xff] %vm1158_vm2, %v1097_v15  ;;  %v427_v1 = vadd.f32 %v1752_v33, %v426_v21  ;;  %957 = vmatmul.f32.gmra.mxu2 %v1444_v16 }
 0x1b2   :  { %1447 = vtanh.f32 %v669_v0  ;;  %715 = vmatmul.f32.gmra.mxu1 %v1446_v22 }
 0x1b3   :  { %1449 = vtanh.f32 %v427_v1 }
 0x1b4   :  { %v910_v2 = vpop.f32.mrf.mxu2 }
 0x1b5   :  { %v911_v23 = vadd.f32 %v2083_v40, %v910_v2 }
 0x1b7   :  { %v1098_v4 = vmax.f32 %v911_v23, %v2088_v41  ;;  %v671_v5 = vpop.f32.mrf.mxu1 }
 0x1b8   :  { %v1448_v24 = vpop.eup %1447  ;;  %v672_v29 = vadd.f32 %v1938_v54, %v671_v5  ;;  %v429_v30 = vpop.f32.mrf.mxu0 }
 0x1b9   :  { %v1450_v6 = vpop.eup %1449  ;;  %1163 = vst.msk [vmem:[%s2613_s8 + $0x20] sm:$0xff] %vm1158_vm2, %v1098_v4  ;;  %v430_v7 = vadd.f32 %v1752_v33, %v429_v30  ;;  %960 = vmatmul.f32.gmra.mxu2 %v1448_v24 }
 0x1ba   :  { %1451 = vtanh.f32 %v672_v29  ;;  %718 = vmatmul.f32.gmra.mxu1 %v1450_v6 }
 0x1bb   :  { %1453 = vtanh.f32 %v430_v7 }
 0x1bc   :  { %v913_v31 = vpop.f32.mrf.mxu2 }
 0x1bd   :  { %v914_v9 = vadd.f32 %v2083_v40, %v913_v31 }
 0x1bf   :  { %v1099_v32 = vmax.f32 %v914_v9, %v2088_v41  ;;  %v674_v38 = vpop.f32.mrf.mxu1 }
 0x1c0   :  { %v1452_v39 = vpop.eup %1451  ;;  %v675_v10 = vadd.f32 %v1938_v54, %v674_v38  ;;  %v432_v11 = vpop.f32.mrf.mxu0 }
 0x1c1   :  { %v1454_v12 = vpop.eup %1453  ;;  %1164 = vst.msk [vmem:[%s2613_s8 + $0x28] sm:$0xff] %vm1158_vm2, %v1099_v32  ;;  %v433_v17 = vadd.f32 %v1752_v33, %v432_v11  ;;  %963 = vmatmul.f32.gmra.mxu2 %v1452_v39  ;;  %v462_v39 = vpop.f32.mrf.mxu3 }
 0x1c2   :  { %1455 = vtanh.f32 %v675_v10  ;;  %721 = vmatmul.f32.gmra.mxu1 %v1454_v12 }
 0x1c3   :  { %1457 = vtanh.f32 %v433_v17 }
 0x1c4   :  { %v916_v18 = vpop.f32.mrf.mxu2 }
 0x1c5   :  { %v917_v20 = vadd.f32 %v2083_v40, %v916_v18 }
 0x1c7   :  { %v1100_v25 = vmax.f32 %v917_v20, %v2088_v41  ;;  %v677_v26 = vpop.f32.mrf.mxu1 }
 0x1c8   :  { %v1456_v27 = vpop.eup %1455  ;;  %v678_v28 = vadd.f32 %v1938_v54, %v677_v26  ;;  %v435_v34 = vpop.f32.mrf.mxu0 }
 0x1c9   :  { %v1458_v35 = vpop.eup %1457  ;;  %1165 = vst.msk [vmem:[%s2613_s8 + $0x30] sm:$0xff] %vm1158_vm2, %v1100_v25  ;;  %v436_v36 = vadd.f32 %v1752_v33, %v435_v34  ;;  %966 = vmatmul.f32.gmra.mxu2 %v1456_v27  ;;  %v465_v34 = vpop.f32.mrf.mxu3 }
 0x1ca   :  { %1459 = vtanh.f32 %v678_v28  ;;  %724 = vmatmul.f32.gmra.mxu1 %v1458_v35 }
 0x1cb   :  { %1461 = vtanh.f32 %v436_v36 }
 0x1cc   :  { %v919_v37 = vpop.f32.mrf.mxu2 }
 0x1cd   :  { %v920_v43 = vadd.f32 %v2083_v40, %v919_v37 }
 0x1cf   :  { %v1101_v44 = vmax.f32 %v920_v43, %v2088_v41  ;;  %v680_v45 = vpop.f32.mrf.mxu1 }
 0x1d0   :  { %v1460_v46 = vpop.eup %1459  ;;  %v681_v47 = vadd.f32 %v1938_v54, %v680_v45  ;;  %v438_v33 = vpop.f32.mrf.mxu0 }
 0x1d1   :  { %v1462_v48 = vpop.eup %1461  ;;  %1166 = vst.msk [vmem:[%s2613_s8 + $0x38] sm:$0xff] %vm1158_vm2, %v1101_v44  ;;  %v439_v50 = vadd.f32 %v2188_v49, %v438_v33  ;;  %969 = vmatmul.f32.gmra.mxu2 %v1460_v46 }
 0x1d2   :  { %1463 = vtanh.f32 %v681_v47  ;;  %727 = vmatmul.f32.gmra.mxu1 %v1462_v48  ;;  %v468_v48 = vpop.f32.mrf.mxu3 }
 0x1d3   :  { %1465 = vtanh.f32 %v439_v50 }
 0x1d4   :  { %v922_v51 = vpop.f32.mrf.mxu2 }
 0x1d5   :  { %v923_v53 = vadd.f32 %v2083_v40, %v922_v51 }
 0x1d7   :  { %v1102_v55 = vmax.f32 %v923_v53, %v2088_v41  ;;  %v683_v56 = vpop.f32.mrf.mxu1 }
 0x1d8   :  { %v1464_v57 = vpop.eup %1463  ;;  %v684_v58 = vadd.f32 %v1938_v54, %v683_v56  ;;  %v441_v59 = vpop.f32.mrf.mxu0 }
 0x1d9   :  { %v1466_v60 = vpop.eup %1465  ;;  %1167 = vst.msk [vmem:[%s2613_s8 + $0x40] sm:$0xff] %vm1158_vm2, %v1102_v55  ;;  %v442_v13 = vadd.f32 %v2188_v49, %v441_v59  ;;  %972 = vmatmul.f32.gmra.mxu2 %v1464_v57 }
 0x1da   :  { %1467 = vtanh.f32 %v684_v58  ;;  %730 = vmatmul.f32.gmra.mxu1 %v1466_v60 }
 0x1db   :  { %1469 = vtanh.f32 %v442_v13  ;;  %v463_v13 = vadd.f32 %v2188_v49, %v462_v39 }
 0x1dc   :  { %v925_v14 = vpop.f32.mrf.mxu2 }
 0x1dd   :  { %v926_v61 = vadd.f32 %v2083_v40, %v925_v14  ;;  %v471_v14 = vpop.f32.mrf.mxu3 }
 0x1df   :  { %v1103_v62 = vmax.f32 %v926_v61, %v2088_v41  ;;  %v686_v15 = vpop.f32.mrf.mxu1 }
 0x1e0   :  { %v1468_v63 = vpop.eup %1467  ;;  %v687_v16 = vadd.f32 %v1938_v54, %v686_v15  ;;  %v444_v0 = vpop.f32.mrf.mxu0 }
 0x1e1   :  { %v1470_v21 = vpop.eup %1469  ;;  %1168 = vst.msk [vmem:[%s2613_s8 + $0x48] sm:$0xff] %vm1158_vm2, %v1103_v62  ;;  %v445_v22 = vadd.f32 %v2188_v49, %v444_v0  ;;  %975 = vmatmul.f32.gmra.mxu2 %v1468_v63 }
 0x1e2   :  { %1471 = vtanh.f32 %v687_v16  ;;  %733 = vmatmul.f32.gmra.mxu1 %v1470_v21 }
 0x1e3   :  { %1473 = vtanh.f32 %v445_v22  ;;  %v466_v22 = vadd.f32 %v2188_v49, %v465_v34 }
 0x1e4   :  { %v928_v1 = vpop.f32.mrf.mxu2 }
 0x1e5   :  { %v929_v2 = vadd.f32 %v2083_v40, %v928_v1 }
 0x1e7   :  { %v1104_v3 = vmax.f32 %v929_v2, %v2088_v41  ;;  %v689_v23 = vpop.f32.mrf.mxu1 }
 0x1e8   :  { %v1472_v4 = vpop.eup %1471  ;;  %v690_v5 = vadd.f32 %v1938_v54, %v689_v23  ;;  %v447_v24 = vpop.f32.mrf.mxu0 }
 0x1e9   :  { %v1474_v29 = vpop.eup %1473  ;;  %1169 = vst.msk [vmem:[%s2613_s8 + $0x50] sm:$0xff] %vm1158_vm2, %v1104_v3  ;;  %v448_v30 = vadd.f32 %v2188_v49, %v447_v24  ;;  %978 = vmatmul.f32.gmra.mxu2 %v1472_v4 }
 0x1ea   :  { %1475 = vtanh.f32 %v690_v5  ;;  %736 = vmatmul.f32.gmra.mxu1 %v1474_v29  ;;  %v474_v5 = vpop.f32.mrf.mxu3 }
 0x1eb   :  { %1477 = vtanh.f32 %v448_v30  ;;  %v469_v30 = vadd.f32 %v2188_v49, %v468_v48 }
 0x1ec   :  { %v931_v6 = vpop.f32.mrf.mxu2 }
 0x1ed   :  { %v932_v7 = vadd.f32 %v2083_v40, %v931_v6 }
 0x1ef   :  { %v1105_v31 = vmax.f32 %v932_v7, %v2088_v41  ;;  %v692_v8 = vpop.f32.mrf.mxu1 }
 0x1f0   :  { %v1476_v9 = vpop.eup %1475  ;;  %v693_v32 = vadd.f32 %v1938_v54, %v692_v8  ;;  %v450_v38 = vpop.f32.mrf.mxu0  ;;  %v2273_v8 = vld [vmem:[%s2609_s4] ss:$0 sm:$0xff] }
 0x1f1   :  { %v1478_v10 = vpop.eup %1477  ;;  %1170 = vst.msk [vmem:[%s2613_s8 + $0x58] sm:$0xff] %vm1158_vm2, %v1105_v31  ;;  %v451_v11 = vadd.f32 %v2188_v49, %v450_v38  ;;  %981 = vmatmul.f32.gmra.mxu2 %v1476_v9 }
 0x1f2   :  { %1479 = vtanh.f32 %v693_v32  ;;  %739 = vmatmul.f32.gmra.mxu1 %v1478_v10  ;;  %v477_v32 = vpop.f32.mrf.mxu3  ;;  %v472_v10 = vadd.f32 %v2188_v49, %v471_v14 }
 0x1f3   :  { %1481 = vtanh.f32 %v451_v11 }
 0x1f4   :  { %v934_v12 = vpop.f32.mrf.mxu2 }
 0x1f5   :  { %v935_v17 = vadd.f32 %v2083_v40, %v934_v12 }
 0x1f7   :  { %v1106_v18 = vmax.f32 %v935_v17, %v2088_v41  ;;  %v695_v19 = vpop.f32.mrf.mxu1 }
 0x1f8   :  { %v1480_v20 = vpop.eup %1479  ;;  %v696_v25 = vadd.f32 %v1938_v54, %v695_v19  ;;  %v453_v26 = vpop.f32.mrf.mxu0 }
 0x1f9   :  { %v1482_v27 = vpop.eup %1481  ;;  %1171 = vst.msk [vmem:[%s2613_s8 + $0x60] sm:$0xff] %vm1158_vm2, %v1106_v18  ;;  %v454_v28 = vadd.f32 %v2188_v49, %v453_v26  ;;  %984 = vmatmul.f32.gmra.mxu2 %v1480_v20 }
 0x1fa   :  { %1483 = vtanh.f32 %v696_v25  ;;  %742 = vmatmul.f32.gmra.mxu1 %v1482_v27  ;;  %v480_v25 = vpop.f32.mrf.mxu3  ;;  %v475_v27 = vadd.f32 %v2188_v49, %v474_v5 }
 0x1fb   :  { %1485 = vtanh.f32 %v454_v28 }
 0x1fc   :  { %v937_v35 = vpop.f32.mrf.mxu2 }
 0x1fd   :  { %v938_v36 = vadd.f32 %v2083_v40, %v937_v35 }
 0x1ff   :  { %v1107_v37 = vmax.f32 %v938_v36, %v2088_v41  ;;  %v698_v42 = vpop.f32.mrf.mxu1 }
 0x200   :  { %v1484_v43 = vpop.eup %1483  ;;  %v699_v44 = vadd.f32 %v1938_v54, %v698_v42  ;;  %v456_v45 = vpop.f32.mrf.mxu0 }
 0x201   :  { %v1486_v46 = vpop.eup %1485  ;;  %1172 = vst.msk [vmem:[%s2613_s8 + $0x68] sm:$0xff] %vm1158_vm2, %v1107_v37  ;;  %v457_v47 = vadd.f32 %v2188_v49, %v456_v45  ;;  %987 = vmatmul.f32.gmra.mxu2 %v1484_v43 }
 0x202   :  { %1487 = vtanh.f32 %v699_v44  ;;  %745 = vmatmul.f32.vlgmr.msrb.gmra.mxu3 %v1486_v46  ;;  %v478_v44 = vadd.f32 %v2188_v49, %v477_v32  ;;  %v483_v45 = vpop.f32.mrf.mxu3 }
 0x203   :  { %1489 = vtanh.f32 %v457_v47 }
 0x204   :  { %v940_v33 = vpop.f32.mrf.mxu2 }
 0x205   :  { %v941_v50 = vadd.f32 %v2083_v40, %v940_v33 }
 0x207   :  { %v1108_v51 = vmax.f32 %v941_v50, %v2088_v41  ;;  %v701_v52 = vpop.f32.mrf.mxu1 }
 0x208   :  { %v1488_v53 = vpop.eup %1487  ;;  %v702_v55 = vadd.f32 %v1938_v54, %v701_v52  ;;  %v459_v56 = vpop.f32.mrf.mxu0 }
 0x209   :  { %v1490_v57 = vpop.eup %1489  ;;  %1173 = vst.msk [vmem:[%s2613_s8 + $0x70] sm:$0xff] %vm1158_vm2, %v1108_v51  ;;  %v460_v58 = vadd.f32 %v2188_v49, %v459_v56  ;;  %990 = vmatmul.f32.gmra.mxu2 %v1488_v53  ;;  %v481_v53 = vadd.f32 %v2188_v49, %v480_v25 }
 0x20a   :  { %1491 = vtanh.f32 %v702_v55  ;;  %748 = vmatmul.f32.gmra.mxu3 %v1490_v57 }
 0x20b   :  { %1493 = vtanh.f32 %v460_v58 }
 0x20c   :  { %v943_v59 = vpop.f32.mrf.mxu2  ;;  %1495 = vtanh.f32 %v463_v13 }
 0x20d   :  { %v944_v60 = vadd.f32 %v2083_v40, %v943_v59 }
 0x20f   :  { %v1109_v61 = vmax.f32 %v944_v60, %v2088_v41  ;;  %v704_v62 = vpop.f32.mrf.mxu1  ;;  %v486_v60 = vpop.f32.mrf.mxu3 }
 0x210   :  { %v1492_v15 = vpop.eup %1491  ;;  %v705_v63 = vadd.f32 %v1938_v54, %v704_v62 }
 0x211   :  { %v1494_v16 = vpop.eup %1493  ;;  %1174 = vst.msk [vmem:[%s2613_s8 + $0x78] sm:$0xff] %vm1158_vm2, %v1109_v61  ;;  %993 = vmatmul.f32.gmra.mxu2 %v1492_v15  ;;  %v484_v61 = vadd.f32 %v2188_v49, %v483_v45 }
 0x212   :  { %1497 = vtanh.f32 %v705_v63  ;;  %751 = vmatmul.f32.gmra.mxu3 %v1494_v16  ;;  %v1496_v1 = vpop.eup %1495 }
 0x213   :  { %1499 = vtanh.f32 %v466_v22 }
 0x214   :  { %v946_v0 = vpop.f32.mrf.mxu2 }
 0x215   :  { %v947_v21 = vadd.f32 %v2083_v40, %v946_v0 }
 0x217   :  { %v1110_v2 = vmax.f32 %v947_v21, %v2088_v41  ;;  %v707_v3 = vpop.f32.mrf.mxu1  ;;  %v489_v21 = vpop.f32.mrf.mxu3 }
 0x218   :  { %v1498_v23 = vpop.eup %1497  ;;  %v708_v4 = vadd.f32 %v1938_v54, %v707_v3 }
 0x219   :  { %1175 = vst.msk [vmem:[%s2613_s8 + $0x80] sm:$0xff] %vm1158_vm2, %v1110_v2  ;;  %996 = vmatmul.f32.gmra.mxu2 %v1498_v23  ;;  %v1500_v6 = vpop.eup %1499  ;;  %v487_v2 = vadd.f32 %v2188_v49, %v486_v60 }
 0x21a   :  { %1501 = vtanh.f32 %v708_v4  ;;  %754 = vmatmul.f32.gmra.mxu3 %v1496_v1 }
 0x21b   :  { %1503 = vtanh.f32 %v469_v30 }
 0x21c   :  { %v949_v24 = vpop.f32.mrf.mxu2 }
 0x21d   :  { %v950_v29 = vadd.f32 %v2083_v40, %v949_v24 }
 0x21f   :  { %v1111_v7 = vmax.f32 %v950_v29, %v2088_v41  ;;  %v710_v31 = vpop.f32.mrf.mxu1  ;;  %v492_v30 = vpop.f32.mrf.mxu3 }
 0x220   :  { %v1502_v54 = vpop.eup %1501  ;;  %v711_v9 = vadd.f32 %v2273_v8, %v710_v31 }
 0x221   :  { %1176 = vst.msk [vmem:[%s2613_s8 + $0x88] sm:$0xff] %vm1158_vm2, %v1111_v7  ;;  %999 = vmatmul.f32.gmra.mxu2 %v1502_v54  ;;  %v1504_v11 = vpop.eup %1503  ;;  %v490_v7 = vadd.f32 %v2188_v49, %v489_v21 }
 0x222   :  { %1505 = vtanh.f32 %v711_v9  ;;  %757 = vmatmul.f32.gmra.mxu3 %v1500_v6 }
 0x223   :  { %1507 = vtanh.f32 %v472_v10 }
 0x224   :  { %v952_v38 = vpop.f32.mrf.mxu2 }
 0x225   :  { %v953_v39 = vadd.f32 %v2083_v40, %v952_v38 }
 0x227   :  { %v1112_v12 = vmax.f32 %v953_v39, %v2088_v41  ;;  %v713_v17 = vpop.f32.mrf.mxu1 }
 0x228   :  { %v1506_v18 = vpop.eup %1505  ;;  %v714_v19 = vadd.f32 %v2273_v8, %v713_v17 }
 0x229   :  { %1177 = vst.msk [vmem:[%s2613_s8 + $0x90] sm:$0xff] %vm1158_vm2, %v1112_v12  ;;  %1002 = vmatmul.f32.gmra.mxu2 %v1506_v18  ;;  %v1508_v28 = vpop.eup %1507  ;;  %v495_v12 = vpop.f32.mrf.mxu3 }
 0x22a   :  { %1509 = vtanh.f32 %v714_v19  ;;  %760 = vmatmul.f32.gmra.mxu3 %v1504_v11  ;;  %v493_v11 = vadd.f32 %v2188_v49, %v492_v30 }
 0x22b   :  { %1511 = vtanh.f32 %v475_v27 }
 0x22c   :  { %v955_v20 = vpop.f32.mrf.mxu2 }
 0x22d   :  { %v956_v26 = vadd.f32 %v2083_v40, %v955_v20 }
 0x22f   :  { %v1113_v34 = vmax.f32 %v956_v26, %v2088_v41  ;;  %v716_v35 = vpop.f32.mrf.mxu1 }
 0x230   :  { %v1510_v36 = vpop.eup %1509  ;;  %v717_v37 = vadd.f32 %v2273_v8, %v716_v35 }
 0x231   :  { %1178 = vst.msk [vmem:[%s2613_s8 + $0x98] sm:$0xff] %vm1158_vm2, %v1113_v34  ;;  %1005 = vmatmul.f32.gmra.mxu2 %v1510_v36  ;;  %v1512_v46 = vpop.eup %1511 }
 0x232   :  { %1513 = vtanh.f32 %v717_v37  ;;  %763 = vmatmul.f32.gmra.mxu3 %v1508_v28  ;;  %v496_v28 = vadd.f32 %v2188_v49, %v495_v12 }
 0x233   :  { %1515 = vtanh.f32 %v478_v44 }
 0x234   :  { %v958_v42 = vpop.f32.mrf.mxu2 }
 0x235   :  { %v959_v43 = vadd.f32 %v2083_v40, %v958_v42 }
 0x237   :  { %v1114_v47 = vmax.f32 %v959_v43, %v2088_v41  ;;  %v719_v33 = vpop.f32.mrf.mxu1  ;;  %v498_v43 = vpop.f32.mrf.mxu3 }
 0x238   :  { %v1514_v48 = vpop.eup %1513  ;;  %v720_v50 = vadd.f32 %v2273_v8, %v719_v33 }
 0x239   :  { %1179 = vst.msk [vmem:[%s2613_s8 + $0xa0] sm:$0xff] %vm1158_vm2, %v1114_v47  ;;  %1008 = vmatmul.f32.gmra.mxu2 %v1514_v48  ;;  %v1516_v55 = vpop.eup %1515 }
 0x23a   :  { %1517 = vtanh.f32 %v720_v50  ;;  %766 = vmatmul.f32.gmra.mxu3 %v1512_v46  ;;  %v499_v46 = vadd.f32 %v2188_v49, %v498_v43 }
 0x23b   :  { %1519 = vtanh.f32 %v481_v53 }
 0x23c   :  { %v961_v51 = vpop.f32.mrf.mxu2 }
 0x23d   :  { %v962_v52 = vadd.f32 %v2083_v40, %v961_v51 }
 0x23f   :  { %v1115_v56 = vmax.f32 %v962_v52, %v2088_v41  ;;  %v722_v57 = vpop.f32.mrf.mxu1  ;;  %v501_v52 = vpop.f32.mrf.mxu3 }
 0x240   :  { %v1518_v58 = vpop.eup %1517  ;;  %v723_v59 = vadd.f32 %v2273_v8, %v722_v57 }
 0x241   :  { %1180 = vst.msk [vmem:[%s2613_s8 + $0xa8] sm:$0xff] %vm1158_vm2, %v1115_v56  ;;  %1011 = vmatmul.f32.gmra.mxu2 %v1518_v58  ;;  %v1520_v62 = vpop.eup %1519  ;;  %v502_v56 = vadd.f32 %v2188_v49, %v501_v52 }
 0x242   :  { %1521 = vtanh.f32 %v723_v59  ;;  %769 = vmatmul.f32.gmra.mxu3 %v1516_v55 }
 0x243   :  { %1523 = vtanh.f32 %v484_v61 }
 0x244   :  { %v964_v13 = vpop.f32.mrf.mxu2 }
 0x245   :  { %v965_v14 = vadd.f32 %v2083_v40, %v964_v13 }
 0x247   :  { %v1116_v15 = vmax.f32 %v965_v14, %v2088_v41  ;;  %v725_v63 = vpop.f32.mrf.mxu1 }
 0x248   :  { %v1522_v16 = vpop.eup %1521  ;;  %v726_v0 = vadd.f32 %v2273_v8, %v725_v63 }
 0x249   :  { %1181 = vst.msk [vmem:[%s2613_s8 + $0xb0] sm:$0xff] %vm1158_vm2, %v1116_v15  ;;  %1014 = vmatmul.f32.gmra.mxu2 %v1522_v16  ;;  %v1524_v3 = vpop.eup %1523 }
 0x24a   :  { %1525 = vtanh.f32 %v726_v0  ;;  %772 = vmatmul.f32.gmra.mxu3 %v1520_v62 }
 0x24b   :  { %1527 = vtanh.f32 %v487_v2 }
 0x24c   :  { %v967_v22 = vpop.f32.mrf.mxu2 }
 0x24d   :  { %v968_v1 = vadd.f32 %v2083_v40, %v967_v22 }
 0x24f   :  { %v1117_v23 = vmax.f32 %v968_v1, %v2088_v41  ;;  %v728_v4 = vpop.f32.mrf.mxu1 }
 0x250   :  { %v1526_v5 = vpop.eup %1525  ;;  %v729_v24 = vadd.f32 %v2273_v8, %v728_v4 }
 0x251   :  { %1182 = vst.msk [vmem:[%s2613_s8 + $0xb8] sm:$0xff] %vm1158_vm2, %v1117_v23  ;;  %1017 = vmatmul.f32.gmra.mxu2 %v1526_v5  ;;  %v1528_v31 = vpop.eup %1527 }
 0x252   :  { %1529 = vtanh.f32 %v729_v24  ;;  %775 = vmatmul.f32.gmra.mxu3 %v1524_v3 }
 0x253   :  { %1531 = vtanh.f32 %v490_v7 }
 0x254   :  { %v970_v29 = vpop.f32.mrf.mxu2 }
 0x255   :  { %v971_v6 = vadd.f32 %v2083_v40, %v970_v29 }
 0x257   :  { %v1118_v54 = vmax.f32 %v971_v6, %v2088_v41  ;;  %v731_v9 = vpop.f32.mrf.mxu1 }
 0x258   :  { %v1530_v32 = vpop.eup %1529  ;;  %v732_v38 = vadd.f32 %v2273_v8, %v731_v9 }
 0x259   :  { %1183 = vst.msk [vmem:[%s2613_s8 + $0xc0] sm:$0xff] %vm1158_vm2, %v1118_v54  ;;  %1020 = vmatmul.f32.gmra.mxu2 %v1530_v32  ;;  %v1532_v17 = vpop.eup %1531 }
 0x25a   :  { %1533 = vtanh.f32 %v732_v38  ;;  %778 = vmatmul.f32.gmra.mxu3 %v1528_v31 }
 0x25b   :  { %1535 = vtanh.f32 %v493_v11 }
 0x25c   :  { %v973_v39 = vpop.f32.mrf.mxu2 }
 0x25d   :  { %v974_v10 = vadd.f32 %v2083_v40, %v973_v39 }
 0x25f   :  { %v1119_v18 = vmax.f32 %v974_v10, %v2088_v41  ;;  %v734_v19 = vpop.f32.mrf.mxu1 }
 0x260   :  { %v1534_v20 = vpop.eup %1533  ;;  %v735_v25 = vadd.f32 %v2273_v8, %v734_v19 }
 0x261   :  { %1184 = vst.msk [vmem:[%s2613_s8 + $0xc8] sm:$0xff] %vm1158_vm2, %v1119_v18  ;;  %1023 = vmatmul.f32.gmra.mxu2 %v1534_v20  ;;  %v1536_v34 = vpop.eup %1535 }
 0x262   :  { %1537 = vtanh.f32 %v735_v25  ;;  %781 = vmatmul.f32.gmra.mxu3 %v1532_v17 }
 0x263   :  { %1539 = vtanh.f32 %v496_v28 }
 0x264   :  { %v976_v26 = vpop.f32.mrf.mxu2 }
 0x265   :  { %v977_v27 = vadd.f32 %v2083_v40, %v976_v26 }
 0x267   :  { %v1120_v35 = vmax.f32 %v977_v27, %v2088_v41  ;;  %v737_v36 = vpop.f32.mrf.mxu1 }
 0x268   :  { %v1538_v37 = vpop.eup %1537  ;;  %v738_v42 = vadd.f32 %v2273_v8, %v737_v36 }
 0x269   :  { %1185 = vst.msk [vmem:[%s2613_s8 + $0xd0] sm:$0xff] %vm1158_vm2, %v1120_v35  ;;  %1026 = vmatmul.f32.gmra.mxu2 %v1538_v37  ;;  %v1540_v47 = vpop.eup %1539 }
 0x26a   :  { %1541 = vtanh.f32 %v738_v42  ;;  %784 = vmatmul.f32.gmra.mxu3 %v1536_v34 }
 0x26b   :  { %1543 = vtanh.f32 %v499_v46 }
 0x26c   :  { %v979_v44 = vpop.f32.mrf.mxu2 }
 0x26d   :  { %v980_v45 = vadd.f32 %v2083_v40, %v979_v44 }
 0x26f   :  { %v1121_v33 = vmax.f32 %v980_v45, %v2088_v41  ;;  %v740_v48 = vpop.f32.mrf.mxu1 }
 0x270   :  { %v1542_v50 = vpop.eup %1541  ;;  %v741_v51 = vadd.f32 %v2273_v8, %v740_v48 }
 0x271   :  { %1186 = vst.msk [vmem:[%s2613_s8 + $0xd8] sm:$0xff] %vm1158_vm2, %v1121_v33  ;;  %1029 = vmatmul.f32.gmra.mxu2 %v1542_v50  ;;  %v1544_v57 = vpop.eup %1543 }
 0x272   :  { %1545 = vtanh.f32 %v741_v51  ;;  %787 = vmatmul.f32.gmra.mxu3 %v1540_v47 }
 0x273   :  { %1547 = vtanh.f32 %v502_v56 }
 0x274   :  { %v982_v53 = vpop.f32.mrf.mxu2 }
 0x275   :  { %v983_v55 = vadd.f32 %v2083_v40, %v982_v53 }
 0x277   :  { %v1122_v58 = vmax.f32 %v983_v55, %v2088_v41  ;;  %v743_v59 = vpop.f32.mrf.mxu1 }
 0x278   :  { %v1546_v60 = vpop.eup %1545  ;;  %v744_v13 = vadd.f32 %v2273_v8, %v743_v59 }
 0x279   :  { %1187 = vst.msk [vmem:[%s2613_s8 + $0xe0] sm:$0xff] %vm1158_vm2, %v1122_v58  ;;  %1032 = vmatmul.f32.gmra.mxu2 %v1546_v60  ;;  %v1548_v49 = vpop.eup %1547  ;;  %v2440_v60 = vld [vmem:[%s2611_s6] ss:$0 sm:$0xff] }
 0x27a   :  { %1549 = vtanh.f32 %v744_v13  ;;  %790 = vmatmul.f32.gmra.mxu3 %v1544_v57 }
 0x27c   :  { %v985_v14 = vpop.f32.mrf.mxu2 }
 0x27d   :  { %v986_v61 = vadd.f32 %v2083_v40, %v985_v14 }
 0x27f   :  { %v1123_v62 = vmax.f32 %v986_v61, %v2088_v41 }
 0x280   :  { %v1550_v15 = vpop.eup %1549 }
 0x281   :  { %1188 = vst.msk [vmem:[%s2613_s8 + $0xe8] sm:$0xff] %vm1158_vm2, %v1123_v62  ;;  %1035 = vmatmul.f32.gmra.mxu2 %v1550_v15 }
 0x282   :  { %793 = vmatmul.f32.gmra.mxu3 %v1548_v49 }
 0x284   :  { %v988_v63 = vpop.f32.mrf.mxu2 }
 0x285   :  { %v989_v16 = vadd.f32 %v2083_v40, %v988_v63  ;;  %v746_v0 = vpop.f32.mrf.mxu3 }
 0x286   :  { %v747_v21 = vadd.f32 %v2273_v8, %v746_v0 }
 0x287   :  { %v1124_v22 = vmax.f32 %v989_v16, %v2088_v41 }
 0x288   :  { %1551 = vtanh.f32 %v747_v21 }
 0x289   :  { %1189 = vst.msk [vmem:[%s2613_s8 + $0xf0] sm:$0xff] %vm1158_vm2, %v1124_v22 }
 0x28c   :  { %v991_v1 = vpop.f32.mrf.mxu2 }
 0x28d   :  { %v992_v2 = vadd.f32 %v2083_v40, %v991_v1  ;;  %v749_v3 = vpop.f32.mrf.mxu3 }
 0x28e   :  { %v1552_v23 = vpop.eup %1551  ;;  %v750_v4 = vadd.f32 %v2273_v8, %v749_v3 }
 0x28f   :  { %v1125_v5 = vmax.f32 %v992_v2, %v2088_v41  ;;  %1038 = vmatmul.f32.vlgmr.msra.gmra.mxu3 %v1552_v23 }
 0x290   :  { %1553 = vtanh.f32 %v750_v4 }
 0x291   :  { %1190 = vst.msk [vmem:[%s2613_s8 + $0xf8] sm:$0xff] %vm1158_vm2, %v1125_v5 }
 0x294   :  { %v994_v24 = vpop.f32.mrf.mxu2 }
 0x295   :  { %v995_v29 = vadd.f32 %v2083_v40, %v994_v24  ;;  %v752_v30 = vpop.f32.mrf.mxu3 }
 0x296   :  { %v1554_v6 = vpop.eup %1553  ;;  %v753_v7 = vadd.f32 %v2273_v8, %v752_v30 }
 0x297   :  { %v1126_v31 = vmax.f32 %v995_v29, %v2088_v41  ;;  %1041 = vmatmul.f32.gmra.mxu3 %v1554_v6 }
 0x298   :  { %1555 = vtanh.f32 %v753_v7 }
 0x299   :  { %1191 = vst.msk [vmem:[%s2613_s8 + $0x100] sm:$0xff] %vm1158_vm2, %v1126_v31 }
 0x29c   :  { %v997_v54 = vpop.f32.mrf.mxu2 }
 0x29d   :  { %v998_v9 = vadd.f32 %v2083_v40, %v997_v54  ;;  %v755_v32 = vpop.f32.mrf.mxu3 }
 0x29e   :  { %v1556_v38 = vpop.eup %1555  ;;  %v756_v39 = vadd.f32 %v2273_v8, %v755_v32 }
 0x29f   :  { %v1127_v10 = vmax.f32 %v998_v9, %v2088_v41  ;;  %1044 = vmatmul.f32.gmra.mxu3 %v1556_v38 }
 0x2a0   :  { %1557 = vtanh.f32 %v756_v39 }
 0x2a1   :  { %1192 = vst.msk [vmem:[%s2613_s8 + $0x108] sm:$0xff] %vm1158_vm2, %v1127_v10 }
 0x2a4   :  { %v1000_v11 = vpop.f32.mrf.mxu2 }
 0x2a5   :  { %v1001_v12 = vadd.f32 %v2083_v40, %v1000_v11  ;;  %v758_v17 = vpop.f32.mrf.mxu3 }
 0x2a6   :  { %v1558_v18 = vpop.eup %1557  ;;  %v759_v19 = vadd.f32 %v2273_v8, %v758_v17 }
 0x2a7   :  { %v1128_v20 = vmax.f32 %v1001_v12, %v2088_v41  ;;  %1047 = vmatmul.f32.gmra.mxu3 %v1558_v18 }
 0x2a8   :  { %1559 = vtanh.f32 %v759_v19 }
 0x2a9   :  { %1193 = vst.msk [vmem:[%s2613_s8 + $0x110] sm:$0xff] %vm1158_vm2, %v1128_v20 }
 0x2ac   :  { %v1003_v25 = vpop.f32.mrf.mxu2 }
 0x2ad   :  { %v1004_v26 = vadd.f32 %v2083_v40, %v1003_v25  ;;  %v761_v27 = vpop.f32.mrf.mxu3 }
 0x2ae   :  { %v1560_v28 = vpop.eup %1559  ;;  %v762_v34 = vadd.f32 %v2273_v8, %v761_v27 }
 0x2af   :  { %v1129_v35 = vmax.f32 %v1004_v26, %v2088_v41  ;;  %1050 = vmatmul.f32.gmra.mxu3 %v1560_v28 }
 0x2b0   :  { %1561 = vtanh.f32 %v762_v34 }
 0x2b1   :  { %1194 = vst.msk [vmem:[%s2613_s8 + $0x118] sm:$0xff] %vm1158_vm2, %v1129_v35 }
 0x2b4   :  { %v1006_v36 = vpop.f32.mrf.mxu2 }
 0x2b5   :  { %v1007_v37 = vadd.f32 %v2083_v40, %v1006_v36  ;;  %v764_v42 = vpop.f32.mrf.mxu3 }
 0x2b6   :  { %v1562_v43 = vpop.eup %1561  ;;  %v765_v44 = vadd.f32 %v2273_v8, %v764_v42 }
 0x2b7   :  { %v1130_v45 = vmax.f32 %v1007_v37, %v2088_v41  ;;  %1053 = vmatmul.f32.gmra.mxu3 %v1562_v43 }
 0x2b8   :  { %1563 = vtanh.f32 %v765_v44 }
 0x2b9   :  { %1195 = vst.msk [vmem:[%s2613_s8 + $0x120] sm:$0xff] %vm1158_vm2, %v1130_v45 }
 0x2bc   :  { %v1009_v46 = vpop.f32.mrf.mxu2 }
 0x2bd   :  { %v1010_v47 = vadd.f32 %v2083_v40, %v1009_v46  ;;  %v767_v33 = vpop.f32.mrf.mxu3 }
 0x2be   :  { %v1564_v48 = vpop.eup %1563  ;;  %v768_v50 = vadd.f32 %v2273_v8, %v767_v33 }
 0x2bf   :  { %v1131_v51 = vmax.f32 %v1010_v47, %v2088_v41  ;;  %1056 = vmatmul.f32.gmra.mxu3 %v1564_v48 }
 0x2c0   :  { %1565 = vtanh.f32 %v768_v50 }
 0x2c1   :  { %1196 = vst.msk [vmem:[%s2613_s8 + $0x128] sm:$0xff] %vm1158_vm2, %v1131_v51 }
 0x2c4   :  { %v1012_v52 = vpop.f32.mrf.mxu2 }
 0x2c5   :  { %v1013_v53 = vadd.f32 %v2083_v40, %v1012_v52  ;;  %v770_v55 = vpop.f32.mrf.mxu3 }
 0x2c6   :  { %v1566_v56 = vpop.eup %1565  ;;  %v771_v57 = vadd.f32 %v2273_v8, %v770_v55 }
 0x2c7   :  { %v1132_v58 = vmax.f32 %v1013_v53, %v2088_v41  ;;  %1059 = vmatmul.f32.gmra.mxu3 %v1566_v56  ;;  %v2447_v41 = vld [vmem:[%s2612_s7] ss:$0 sm:$0xff] }
 0x2c8   :  { %1567 = vtanh.f32 %v771_v57 }
 0x2c9   :  { %1197 = vst.msk [vmem:[%s2613_s8 + $0x130] sm:$0xff] %vm1158_vm2, %v1132_v58 }
 0x2cc   :  { %v1015_v59 = vpop.f32.mrf.mxu2 }
 0x2cd   :  { %v1016_v40 = vadd.f32 %v2440_v60, %v1015_v59  ;;  %v773_v13 = vpop.f32.mrf.mxu3 }
 0x2ce   :  { %v1568_v14 = vpop.eup %1567  ;;  %v774_v61 = vadd.f32 %v2273_v8, %v773_v13 }
 0x2cf   :  { %v1133_v49 = vmax.f32 %v1016_v40, %v2447_v41  ;;  %1062 = vmatmul.f32.gmra.mxu3 %v1568_v14 }
 0x2d0   :  { %1569 = vtanh.f32 %v774_v61 }
 0x2d1   :  { %1198 = vst.msk [vmem:[%s2613_s8 + $0x138] sm:$0xff] %vm1158_vm2, %v1133_v49 }
 0x2d4   :  { %v1018_v62 = vpop.f32.mrf.mxu2 }
 0x2d5   :  { %v1019_v15 = vadd.f32 %v2440_v60, %v1018_v62  ;;  %v776_v63 = vpop.f32.mrf.mxu3 }
 0x2d6   :  { %v1570_v16 = vpop.eup %1569  ;;  %v777_v0 = vadd.f32 %v2273_v8, %v776_v63 }
 0x2d7   :  { %v1134_v21 = vmax.f32 %v1019_v15, %v2447_v41  ;;  %1065 = vmatmul.f32.gmra.mxu3 %v1570_v16 }
 0x2d8   :  { %1571 = vtanh.f32 %v777_v0 }
 0x2d9   :  { %1199 = vst.msk [vmem:[%s2613_s8 + $0x140] sm:$0xff] %vm1158_vm2, %v1134_v21 }
 0x2dc   :  { %v1021_v22 = vpop.f32.mrf.mxu2 }
 0x2dd   :  { %v1022_v1 = vadd.f32 %v2440_v60, %v1021_v22  ;;  %v779_v2 = vpop.f32.mrf.mxu3 }
 0x2de   :  { %v1572_v3 = vpop.eup %1571  ;;  %v780_v23 = vadd.f32 %v2273_v8, %v779_v2 }
 0x2df   :  { %v1135_v4 = vmax.f32 %v1022_v1, %v2447_v41  ;;  %1068 = vmatmul.f32.gmra.mxu3 %v1572_v3 }
 0x2e0   :  { %1573 = vtanh.f32 %v780_v23 }
 0x2e1   :  { %1200 = vst.msk [vmem:[%s2613_s8 + $0x148] sm:$0xff] %vm1158_vm2, %v1135_v4 }
 0x2e4   :  { %v1024_v5 = vpop.f32.mrf.mxu2 }
 0x2e5   :  { %v1025_v24 = vadd.f32 %v2440_v60, %v1024_v5  ;;  %v782_v29 = vpop.f32.mrf.mxu3 }
 0x2e6   :  { %v1574_v30 = vpop.eup %1573  ;;  %v783_v6 = vadd.f32 %v2273_v8, %v782_v29 }
 0x2e7   :  { %v1136_v7 = vmax.f32 %v1025_v24, %v2447_v41  ;;  %1071 = vmatmul.f32.gmra.mxu3 %v1574_v30 }
 0x2e8   :  { %1575 = vtanh.f32 %v783_v6 }
 0x2e9   :  { %1201 = vst.msk [vmem:[%s2613_s8 + $0x150] sm:$0xff] %vm1158_vm2, %v1136_v7 }
 0x2ec   :  { %v1027_v31 = vpop.f32.mrf.mxu2 }
 0x2ed   :  { %v1028_v54 = vadd.f32 %v2440_v60, %v1027_v31  ;;  %v785_v9 = vpop.f32.mrf.mxu3 }
 0x2ee   :  { %v1576_v32 = vpop.eup %1575  ;;  %v786_v38 = vadd.f32 %v2273_v8, %v785_v9 }
 0x2ef   :  { %v1137_v39 = vmax.f32 %v1028_v54, %v2447_v41  ;;  %1074 = vmatmul.f32.gmra.mxu3 %v1576_v32 }
 0x2f0   :  { %1577 = vtanh.f32 %v786_v38 }
 0x2f1   :  { %1202 = vst.msk [vmem:[%s2613_s8 + $0x158] sm:$0xff] %vm1158_vm2, %v1137_v39 }
 0x2f4   :  { %v1030_v10 = vpop.f32.mrf.mxu2 }
 0x2f5   :  { %v1031_v11 = vadd.f32 %v2440_v60, %v1030_v10  ;;  %v788_v12 = vpop.f32.mrf.mxu3 }
 0x2f6   :  { %v1578_v17 = vpop.eup %1577  ;;  %v789_v18 = vadd.f32 %v2273_v8, %v788_v12 }
 0x2f7   :  { %v1138_v19 = vmax.f32 %v1031_v11, %v2447_v41  ;;  %1077 = vmatmul.f32.gmra.mxu3 %v1578_v17 }
 0x2f8   :  { %1579 = vtanh.f32 %v789_v18 }
 0x2f9   :  { %1203 = vst.msk [vmem:[%s2613_s8 + $0x160] sm:$0xff] %vm1158_vm2, %v1138_v19 }
 0x2fc   :  { %v1033_v20 = vpop.f32.mrf.mxu2 }
 0x2fd   :  { %v1034_v25 = vadd.f32 %v2440_v60, %v1033_v20  ;;  %v791_v26 = vpop.f32.mrf.mxu3 }
 0x2fe   :  { %v1580_v27 = vpop.eup %1579  ;;  %v792_v28 = vadd.f32 %v2273_v8, %v791_v26 }
 0x2ff   :  { %v1139_v34 = vmax.f32 %v1034_v25, %v2447_v41  ;;  %1080 = vmatmul.f32.gmra.mxu3 %v1580_v27 }
 0x300   :  { %1581 = vtanh.f32 %v792_v28 }
 0x301   :  { %1204 = vst.msk [vmem:[%s2613_s8 + $0x168] sm:$0xff] %vm1158_vm2, %v1139_v34 }
 0x304   :  { %v1036_v35 = vpop.f32.mrf.mxu2 }
 0x305   :  { %v1037_v36 = vadd.f32 %v2440_v60, %v1036_v35  ;;  %v794_v37 = vpop.f32.mrf.mxu3 }
 0x306   :  { %v1582_v42 = vpop.eup %1581  ;;  %v795_v43 = vadd.f32 %v2273_v8, %v794_v37 }
 0x307   :  { %v1140_v44 = vmax.f32 %v1037_v36, %v2447_v41  ;;  %1083 = vmatmul.f32.gmra.mxu3 %v1582_v42 }
 0x308   :  { %1583 = vtanh.f32 %v795_v43 }
 0x309   :  { %1205 = vst.msk [vmem:[%s2613_s8 + $0x170] sm:$0xff] %vm1158_vm2, %v1140_v44 }
 0x30e   :  { %v1584_v45 = vpop.eup %1583 }
 0x30f   :  { %1086 = vmatmul.f32.gmra.mxu3 %v1584_v45 }
 0x312   :  { %v1039_v46 = vpop.f32.mrf.mxu3 }
 0x313   :  { %v1040_v47 = vadd.f32 %v2440_v60, %v1039_v46 }
 0x315   :  { %v1141_v33 = vmax.f32 %v1040_v47, %v2447_v41 }
 0x317   :  { %1206 = vst.msk [vmem:[%s2613_s8 + $0x178] sm:$0xff] %vm1158_vm2, %v1141_v33 }
 0x31a   :  { %v1042_v8 = vpop.f32.mrf.mxu3 }
 0x31b   :  { %v1043_v48 = vadd.f32 %v2440_v60, %v1042_v8 }
 0x31d   :  { %v1142_v50 = vmax.f32 %v1043_v48, %v2447_v41 }
 0x31f   :  { %1207 = vst.msk [vmem:[%s2613_s8 + $0x180] sm:$0xff] %vm1158_vm2, %v1142_v50 }
 0x322   :  { %v1045_v51 = vpop.f32.mrf.mxu3 }
 0x323   :  { %v1046_v52 = vadd.f32 %v2440_v60, %v1045_v51 }
 0x325   :  { %v1143_v53 = vmax.f32 %v1046_v52, %v2447_v41 }
 0x327   :  { %1208 = vst.msk [vmem:[%s2613_s8 + $0x188] sm:$0xff] %vm1158_vm2, %v1143_v53 }
 0x32a   :  { %v1048_v55 = vpop.f32.mrf.mxu3 }
 0x32b   :  { %v1049_v56 = vadd.f32 %v2440_v60, %v1048_v55 }
 0x32d   :  { %v1144_v57 = vmax.f32 %v1049_v56, %v2447_v41 }
 0x32f   :  { %1209 = vst.msk [vmem:[%s2613_s8 + $0x190] sm:$0xff] %vm1158_vm2, %v1144_v57 }
 0x332   :  { %v1051_v58 = vpop.f32.mrf.mxu3 }
 0x333   :  { %v1052_v59 = vadd.f32 %v2440_v60, %v1051_v58 }
 0x335   :  { %v1145_v40 = vmax.f32 %v1052_v59, %v2447_v41 }
 0x337   :  { %1210 = vst.msk [vmem:[%s2613_s8 + $0x198] sm:$0xff] %vm1158_vm2, %v1145_v40 }
 0x33a   :  { %v1054_v13 = vpop.f32.mrf.mxu3 }
 0x33b   :  { %v1055_v14 = vadd.f32 %v2440_v60, %v1054_v13 }
 0x33d   :  { %v1146_v61 = vmax.f32 %v1055_v14, %v2447_v41 }
 0x33f   :  { %1211 = vst.msk [vmem:[%s2613_s8 + $0x1a0] sm:$0xff] %vm1158_vm2, %v1146_v61 }
 0x342   :  { %v1057_v49 = vpop.f32.mrf.mxu3 }
 0x343   :  { %v1058_v62 = vadd.f32 %v2440_v60, %v1057_v49 }
 0x345   :  { %v1147_v15 = vmax.f32 %v1058_v62, %v2447_v41 }
 0x347   :  { %1212 = vst.msk [vmem:[%s2613_s8 + $0x1a8] sm:$0xff] %vm1158_vm2, %v1147_v15 }
 0x34a   :  { %v1060_v63 = vpop.f32.mrf.mxu3 }
 0x34b   :  { %v1061_v16 = vadd.f32 %v2440_v60, %v1060_v63 }
 0x34d   :  { %v1148_v0 = vmax.f32 %v1061_v16, %v2447_v41 }
 0x34f   :  { %1213 = vst.msk [vmem:[%s2613_s8 + $0x1b0] sm:$0xff] %vm1158_vm2, %v1148_v0 }
 0x352   :  { %v1063_v21 = vpop.f32.mrf.mxu3 }
 0x353   :  { %v1064_v22 = vadd.f32 %v2440_v60, %v1063_v21 }
 0x355   :  { %v1149_v1 = vmax.f32 %v1064_v22, %v2447_v41 }
 0x357   :  { %1214 = vst.msk [vmem:[%s2613_s8 + $0x1b8] sm:$0xff] %vm1158_vm2, %v1149_v1 }
 0x35a   :  { %v1066_v2 = vpop.f32.mrf.mxu3 }
 0x35b   :  { %v1067_v3 = vadd.f32 %v2440_v60, %v1066_v2 }
 0x35d   :  { %v1150_v23 = vmax.f32 %v1067_v3, %v2447_v41 }
 0x35f   :  { %1215 = vst.msk [vmem:[%s2613_s8 + $0x1c0] sm:$0xff] %vm1158_vm2, %v1150_v23 }
 0x362   :  { %v1069_v4 = vpop.f32.mrf.mxu3 }
 0x363   :  { %v1070_v5 = vadd.f32 %v2440_v60, %v1069_v4 }
 0x365   :  { %v1151_v24 = vmax.f32 %v1070_v5, %v2447_v41 }
 0x367   :  { %1216 = vst.msk [vmem:[%s2613_s8 + $0x1c8] sm:$0xff] %vm1158_vm2, %v1151_v24 }
 0x36a   :  { %v1072_v29 = vpop.f32.mrf.mxu3 }
 0x36b   :  { %v1073_v30 = vadd.f32 %v2440_v60, %v1072_v29 }
 0x36d   :  { %v1152_v6 = vmax.f32 %v1073_v30, %v2447_v41 }
 0x36f   :  { %1217 = vst.msk [vmem:[%s2613_s8 + $0x1d0] sm:$0xff] %vm1158_vm2, %v1152_v6 }
 0x372   :  { %v1075_v7 = vpop.f32.mrf.mxu3 }
 0x373   :  { %v1076_v31 = vadd.f32 %v2440_v60, %v1075_v7 }
 0x375   :  { %v1153_v54 = vmax.f32 %v1076_v31, %v2447_v41 }
 0x377   :  { %1218 = vst.msk [vmem:[%s2613_s8 + $0x1d8] sm:$0xff] %vm1158_vm2, %v1153_v54 }
 0x37a   :  { %v1078_v9 = vpop.f32.mrf.mxu3 }
 0x37b   :  { %v1079_v32 = vadd.f32 %v2440_v60, %v1078_v9 }
 0x37d   :  { %v1154_v38 = vmax.f32 %v1079_v32, %v2447_v41 }
 0x37f   :  { %1219 = vst.msk [vmem:[%s2613_s8 + $0x1e0] sm:$0xff] %vm1158_vm2, %v1154_v38 }
 0x382   :  { %v1081_v39 = vpop.f32.mrf.mxu3 }
 0x383   :  { %v1082_v10 = vadd.f32 %v2440_v60, %v1081_v39 }
 0x385   :  { %v1155_v11 = vmax.f32 %v1082_v10, %v2447_v41 }
 0x387   :  { %1220 = vst.msk [vmem:[%s2613_s8 + $0x1e8] sm:$0xff] %vm1158_vm2, %v1155_v11 }
 0x38a   :  { %v1084_v12 = vpop.f32.mrf.mxu3 }
 0x38b   :  { %v1085_v17 = vadd.f32 %v2440_v60, %v1084_v12 }
 0x38d   :  { %v1156_v18 = vmax.f32 %v1085_v17, %v2447_v41 }
 0x38f   :  { %1221 = vst.msk [vmem:[%s2613_s8 + $0x1f0] sm:$0xff] %vm1158_vm2, %v1156_v18 }
 0x392   :  { %v1087_v19 = vpop.f32.mrf.mxu3 }
 0x393   :  { %v1088_v20 = vadd.f32 %v2440_v60, %v1087_v19 }
 0x395   :  { %v1157_v25 = vmax.f32 %v1088_v20, %v2447_v41 }
 0x397   :  { %1222 = vst.msk [vmem:[%s2613_s8 + $0x1f8] sm:$0xff] %vm1158_vm2, %v1157_v25 }

</bundles_post_ra>
